<compile_context>
chip_gen: v7x
topology: tpu7x:2x2x1
jax: 0.10.0
libtpu: 0.0.40
codegen_flags: <defaults>
</compile_context>

<pallas_src>
import functools
import math

import jax
import jax.numpy as jnp
import numpy as np
from jax import lax
from jax.experimental import pallas as pl
from jax.experimental.pallas import tpu as pltpu


def _round_up(a, b):
    return (a + b - 1) // b * b


def _pad2(a, rows, cols):
    r, c = a.shape
    return jnp.pad(a, ((0, rows - r), (0, cols - c)))


def _l2_normalize(v, eps=1e-12):
    # matches torch.nn.functional.normalize(p=2, dim=-1) — wrapper/reference use.
    n = jnp.sqrt(jnp.sum(v * v, axis=-1, keepdims=True))
    return v / jnp.maximum(n, eps)


def _l2n_kernel(v, eps=1e-12):
    # In-kernel l2-normalize: single EUP rsqrt instead of sqrt + divide.
    ss = jnp.sum(v * v, axis=-1, keepdims=True)
    return v * lax.rsqrt(jnp.maximum(ss, eps * eps))


def _choose_tm(M, tm_cap):
    """Row-tile size: multiple of 16, <= tm_cap.  Prefers the largest tile that
    wastes <= ~10% padded rows and keeps >= 2 grid steps when M allows
    (v7x has 2 TensorCores; a 1-step grid serializes onto one)."""
    tm_cap = max(16, (tm_cap // 16) * 16)
    best, best_key = 16, None
    for tm in range(16, tm_cap + 1, 16):
        m_pad = _round_up(M, tm)
        steps = m_pad // tm
        waste = (m_pad - M) / float(M)
        penalty = (waste if waste > 0.10 else 0.0)
        if steps < 2 and M > 16:
            penalty += 0.05
        key = (penalty, -tm)
        if best_key is None or key < best_key:
            best, best_key = tm, key
    return best


def clip_head_kernel(
    x_ref,          # (TM, E_in)        input rows (f32 or bf16)
    ln_g_ref,       # (1, E_in)         layer_norm weight (f32)
    ln_b_ref,       # (1, E_in)         layer_norm bias (f32)
    proj_ref,       # (E_in, D_pad)     projection matrix (bf16, zero-padded)
    cls_t_ref,      # (D_pad, Ncls_pad) classes_embeddings_normed.T (bf16, zero-padded)
    kp_t_ref,       # (D_pad, Nall_pad) ((all_normed @ Wk).T * scale)   [hoisted] (bf16)
    vp_ref,         # (Nall_pad, D_pad) all_classes_embeddings @ Wv     [hoisted] (bf16)
    wq_ref,         # (D_pad, D_pad)    attention Wq (bf16)
    pw_ref,         # (D_pad, D_pad)    attention output proj weight (bf16)
    pb_ref,         # (1, D_pad)        attention output proj bias (f32)
    mlp_w_ref,      # (D_pad, Dm_pad)   (bf16)
    mlp_b_ref,      # (1, Dm_pad)       (f32)
    last_w_ref,     # (Dm_pad, K_pad)   (bf16)
    out_ref,        # (TM, K_pad)       f32
    pred_ref,       # (TM, Ncls_pad)    bf16 (or f32)
    *,
    lambda_modality,
    ln_eps,
    n_all,          # true number of keys (static)
    n_all_pad,      # padded number of keys (static)
):
    bf16 = jnp.bfloat16
    x = x_ref[...].astype(jnp.float32)

    # ---- LayerNorm over the true E_in (E_in is never padded) ----
    mean = jnp.mean(x, axis=-1, keepdims=True)
    var = jnp.mean((x - mean) ** 2, axis=-1, keepdims=True)
    xn = (x - mean) * lax.rsqrt(var + ln_eps)
    xn = xn * ln_g_ref[...] + ln_b_ref[...]

    # ---- projection (bf16 MXU, f32 accumulate) ----
    xp = jnp.dot(xn.astype(bf16), proj_ref[...],
                 preferred_element_type=jnp.float32)                 # (TM, D_pad) f32
    xp_bf = xp.astype(bf16)

    # ---- class predictions (no_grad branch) ----
    pred_ref[...] = jnp.dot(xp_bf, cls_t_ref[...],
                            preferred_element_type=jnp.float32
                            ).astype(pred_ref.dtype)                 # (TM, Ncls_pad)

    # ---- single-head MMAttention over class embeddings ----
    q = _l2n_kernel(xp)                                              # (TM, D_pad) f32; reused as x_n
    qp = jnp.dot(q.astype(bf16), wq_ref[...],
                 preferred_element_type=jnp.float32)                 # (TM, D_pad)

    # 1/sqrt(head_dim) is folded into kp_t in the wrapper; kp is pre-transposed
    # -> plain MXU matmul, no in-kernel transpose, no extra VALU multiply.
    scores = jnp.dot(qp.astype(bf16), kp_t_ref[...],
                     preferred_element_type=jnp.float32)             # (TM, Nall_pad)

    if n_all_pad > n_all:
        # Zero-padded key lanes must NOT get softmax mass: mask to -inf-ish.
        key_idx = lax.broadcasted_iota(jnp.int32, scores.shape, 1)
        scores = jnp.where(key_idx < n_all, scores, jnp.float32(-1e30))

    # softmax over keys (f32; reciprocal on the EUP slot)
    m = jnp.max(scores, axis=-1, keepdims=True)
    e = jnp.exp(scores - m)
    attn = e * pl.reciprocal(jnp.sum(e, axis=-1, keepdims=True), approx=True)

    att = jnp.dot(attn.astype(bf16), vp_ref[...],
                  preferred_element_type=jnp.float32)                # (TM, D_pad)
    att = jnp.dot(att.astype(bf16), pw_ref[...],
                  preferred_element_type=jnp.float32) + pb_ref[...]

    # ---- modality mixing (x_n == q: reuse, no recompute) ----
    att_n = _l2n_kernel(att)
    mixed = (1.0 - lambda_modality) * q + lambda_modality * att_n

    # ---- mlp -> normalize -> last_layer ----
    h = jnp.dot(mixed.astype(bf16), mlp_w_ref[...],
                preferred_element_type=jnp.float32) + mlp_b_ref[...]
    h = _l2n_kernel(h)
    out_ref[...] = jnp.dot(h.astype(bf16), last_w_ref[...],
                           preferred_element_type=jnp.float32
                           ).astype(out_ref.dtype)                   # (TM, K_pad)


def clip_head_forward(x, params, *, tm=512, lambda_modality=0.1, ln_eps=1e-5,
                      vmem_limit_bytes=None, x_bf16=False, pred_bf16=True):
    """x: (B, L, E_in).  Returns (out (B, L, K), class_predictions (B, L, N_cls))."""
    B, L, E_in = x.shape
    M = B * L

    D = params["projection"].shape[1]
    N_cls = params["cls_normed_T"].shape[1]
    N_all = params["all_emb"].shape[0]
    Dm = params["mlp_w"].shape[1]
    K = params["last_w"].shape[1]

    f32, bf16 = jnp.float32, jnp.bfloat16

    # ---- lane-dense padding (all multiples of 128); E_in deliberately NOT padded ----
    D_pad = _round_up(D, 128)
    Dm_pad = _round_up(Dm, 128)
    N_all_pad = _round_up(N_all, 128)
    N_cls_pad = _round_up(N_cls, 128)
    K_pad = _round_up(K, 128)

    # ---- per-generation VMEM limit (<=48 MiB on 64 MiB v7x, ~96 MiB on 128 MiB chips) ----
    if vmem_limit_bytes is None:
        try:
            cap = int(pltpu.get_tpu_info().vmem_capacity_bytes)
        except Exception:
            cap = 128 * 1024 * 1024
        vmem_limit_bytes = min(int(cap * 3 // 4), 100 * 1024 * 1024)

    # ---- VMEM budget -> row-tile cap (weights counted 2x in case single-buffering
    #      falls back to the default double-buffered pipeline) ----
    w_bytes = 2 * (E_in * D_pad + D_pad * N_cls_pad + 2 * D_pad * N_all_pad
                   + 2 * D_pad * D_pad + D_pad * Dm_pad + Dm_pad * K_pad) \
              + 4 * (2 * E_in + D_pad + Dm_pad)
    row_bytes = (
        (2 if x_bf16 else 4) * 2 * E_in                               # x tile (dbl-buffered)
        + (2 if pred_bf16 else 4) * 2 * N_cls_pad + 4 * 2 * K_pad     # out tiles (dbl-buffered)
        + 4 * (2 * E_in + 4 * D_pad + 3 * N_all_pad + Dm_pad + K_pad + N_cls_pad)  # f32 temps
        + 2 * (E_in + 2 * D_pad + N_all_pad + Dm_pad))                # bf16 casts
    avail = vmem_limit_bytes - 2 * w_bytes - 8 * 1024 * 1024
    tm_cap = min(tm, max(16, avail // row_bytes)) if avail > 0 else 16
    tm_eff = _choose_tm(M, tm_cap)
    M_pad = _round_up(M, tm_eff)

    # ---- input rows ----
    x2 = x.reshape(M, E_in).astype(bf16 if x_bf16 else f32)
    if M_pad > M:
        x2 = jnp.pad(x2, ((0, M_pad - M), (0, 0)))

    # ---- hoist row-independent attention projections out of the kernel,
    #      fold the attention scale into kp_t ----
    scale = 1.0 / math.sqrt(D)   # num_heads=1 -> head_dim = D
    kp_t = (params["all_normed"].astype(f32) @ params["wk"].astype(f32)).T * scale  # (D, N_all)
    vp = params["all_emb"].astype(f32) @ params["wv"].astype(f32)                   # (N_all, D)

    # ---- cast matmul operands to bf16, keep add/normalize params in f32; zero-pad ----
    proj = _pad2(params["projection"].astype(f32), E_in, D_pad).astype(bf16)
    cls_t = _pad2(params["cls_normed_T"].astype(f32), D_pad, N_cls_pad).astype(bf16)
    kp_t = _pad2(kp_t, D_pad, N_all_pad).astype(bf16)
    vp = _pad2(vp, N_all_pad, D_pad).astype(bf16)
    wq = _pad2(params["wq"].astype(f32), D_pad, D_pad).astype(bf16)
    pw = _pad2(params["proj_w"].astype(f32), D_pad, D_pad).astype(bf16)
    pb = _pad2(params["proj_b"].astype(f32), 1, D_pad)
    mlp_w = _pad2(params["mlp_w"].astype(f32), D_pad, Dm_pad).astype(bf16)
    mlp_b = _pad2(params["mlp_b"].astype(f32), 1, Dm_pad)
    last_w = _pad2(params["last_w"].astype(f32), Dm_pad, K_pad).astype(bf16)
    ln_g = params["ln_gamma"].astype(f32)
    ln_b = params["ln_beta"].astype(f32)

    kernel = functools.partial(
        clip_head_kernel, lambda_modality=lambda_modality, ln_eps=ln_eps,
        n_all=N_all, n_all_pad=N_all_pad)

    out_shape = (
        jax.ShapeDtypeStruct((M_pad, K_pad), f32),
        jax.ShapeDtypeStruct((M_pad, N_cls_pad), bf16 if pred_bf16 else f32),
    )

    def _make_call(single_buffer_weights):
        if single_buffer_weights:
            # Constant index_map already skips re-DMA after step 0; Buffered(1)
            # additionally halves the resident weight VMEM.
            def wspec(shape):
                return pl.BlockSpec(shape, lambda i: (0, 0),
                                    pipeline_mode=pl.Buffered(1))
        else:
            def wspec(shape):
                return pl.BlockSpec(shape, lambda i: (0, 0))
        return pl.pallas_call(
            kernel,
            out_shape=out_shape,
            grid_spec=pltpu.PrefetchScalarGridSpec(
                num_scalar_prefetch=0,
                grid=(M_pad // tm_eff,),
                in_specs=[
                    pl.BlockSpec((tm_eff, E_in), lambda i: (i, 0)),   # x rows
                    wspec((1, E_in)),                                 # ln gamma
                    wspec((1, E_in)),                                 # ln beta
                    wspec((E_in, D_pad)),                             # projection
                    wspec((D_pad, N_cls_pad)),                        # classes_normed^T
                    wspec((D_pad, N_all_pad)),                        # kp^T (hoisted, scaled)
                    wspec((N_all_pad, D_pad)),                        # vp (hoisted)
                    wspec((D_pad, D_pad)),                            # Wq
                    wspec((D_pad, D_pad)),                            # attn proj W
                    wspec((1, D_pad)),                                # attn proj b
                    wspec((D_pad, Dm_pad)),                           # mlp W
                    wspec((1, Dm_pad)),                               # mlp b
                    wspec((Dm_pad, K_pad)),                           # last W
                ],
                out_specs=[
                    pl.BlockSpec((tm_eff, K_pad), lambda i: (i, 0)),
                    pl.BlockSpec((tm_eff, N_cls_pad), lambda i: (i, 0)),
                ],
            ),
            compiler_params=pltpu.CompilerParams(
                dimension_semantics=("parallel",),
                vmem_limit_bytes=vmem_limit_bytes),
        )

    args = (x2, ln_g, ln_b, proj, cls_t, kp_t, vp, wq, pw, pb, mlp_w, mlp_b, last_w)
    try:
        res = _make_call(True)(*args)
        jax.block_until_ready(res)
    except Exception:
        # pipeline_mode=Buffered(1) unsupported on this jax/Mosaic version:
        # fall back to default double-buffered weight specs.
        res = _make_call(False)(*args)
    out, pred = res

    out = out[:M, :K].reshape(B, L, K)
    pred = pred[:M, :N_cls].astype(f32).reshape(B, L, N_cls)
    return out, pred


def _reference_forward(x, params, lambda_modality=0.1, ln_eps=1e-5):
    """Pure-JAX f32 reference of the same math (for correctness check)."""
    xn = (x - x.mean(-1, keepdims=True)) * lax.rsqrt(
        x.var(-1, keepdims=True) + ln_eps)
    xn = xn * params["ln_gamma"][0] + params["ln_beta"][0]
    xp = xn @ params["projection"]
    pred = xp @ params["cls_normed_T"]
    q = _l2_normalize(xp)
    qp = q @ params["wq"]
    kp = params["all_normed"] @ params["wk"]
    vp = params["all_emb"] @ params["wv"]
    scale = 1.0 / math.sqrt(qp.shape[-1])
    scores = jnp.einsum("bld,nd->bln", qp, kp) * scale
    attn = jax.nn.softmax(scores, axis=-1)
    att = jnp.einsum("bln,nd->bld", attn, vp) @ params["proj_w"] + params["proj_b"][0]
    mixed = (1.0 - lambda_modality) * _l2_normalize(xp) + lambda_modality * _l2_normalize(att)
    h = _l2_normalize(mixed @ params["mlp_w"] + params["mlp_b"][0])
    return h @ params["last_w"], pred


if __name__ == "__main__":
    # Small shapes consistent with the forward pass.
    B, L, E_in = 2, 8, 32       # input tokens: (batch, seq, embed)
    D = 16                      # projection / class-embedding dim
    N_all, N_cls = 12, 6        # all-class vocab, selected classes
    Dm, K = 24, 10              # mlp hidden, output dim

    key = jax.random.PRNGKey(0)
    ks = jax.random.split(key, 16)
    f32 = jnp.float32

    all_emb = jax.random.normal(ks[0], (N_all, D), f32)
    cls_emb = jax.random.normal(ks[1], (N_cls, D), f32)

    params = dict(
        ln_gamma=(1.0 + 0.1 * jax.random.normal(ks[2], (1, E_in), f32)),
        ln_beta=(0.1 * jax.random.normal(ks[3], (1, E_in), f32)),
        projection=jax.random.normal(ks[4], (E_in, D), f32) / math.sqrt(E_in),
        cls_normed_T=_l2_normalize(cls_emb).T,
        all_normed=_l2_normalize(all_emb),
        all_emb=all_emb,
        wq=jax.random.normal(ks[5], (D, D), f32) / math.sqrt(D),
        wk=jax.random.normal(ks[6], (D, D), f32) / math.sqrt(D),
        wv=jax.random.normal(ks[7], (D, D), f32) / math.sqrt(D),
        proj_w=jax.random.normal(ks[8], (D, D), f32) / math.sqrt(D),
        proj_b=0.01 * jax.random.normal(ks[9], (1, D), f32),
        mlp_w=jax.random.normal(ks[10], (D, Dm), f32) / math.sqrt(D),
        mlp_b=0.01 * jax.random.normal(ks[11], (1, Dm), f32),
        last_w=jax.random.normal(ks[12], (Dm, K), f32) / math.sqrt(Dm),
    )

    x = jax.random.normal(ks[13], (B, L, E_in), f32)

    out, pred = clip_head_forward(x, params)
    jax.block_until_ready((out, pred))

    # Correctness vs f32 reference (bf16 MXU, bf16 pred store, approx reciprocal
    # -> relaxed tolerance).
    ref_out, ref_pred = _reference_forward(x, params)
    np.testing.assert_allclose(np.asarray(out), np.asarray(ref_out), rtol=3e-2, atol=3e-2)
    np.testing.assert_allclose(np.asarray(pred), np.asarray(ref_pred), rtol=3e-2, atol=3e-2)

    print("KERNEL_OK")
</pallas_src>

<mosaic_0001>
module attributes {stable_mosaic.version = 11 : i64} {
  func.func @clip_head_kernel(%arg0: i32, %arg1: memref<16x32xf32, #tpu.memory_space<vmem>>, %arg2: memref<1x32xf32, #tpu.memory_space<vmem>>, %arg3: memref<1x32xf32, #tpu.memory_space<vmem>>, %arg4: memref<32x128xbf16, #tpu.memory_space<vmem>>, %arg5: memref<128x128xbf16, #tpu.memory_space<vmem>>, %arg6: memref<128x128xbf16, #tpu.memory_space<vmem>>, %arg7: memref<128x128xbf16, #tpu.memory_space<vmem>>, %arg8: memref<128x128xbf16, #tpu.memory_space<vmem>>, %arg9: memref<128x128xbf16, #tpu.memory_space<vmem>>, %arg10: memref<1x128xf32, #tpu.memory_space<vmem>>, %arg11: memref<128x128xbf16, #tpu.memory_space<vmem>>, %arg12: memref<1x128xf32, #tpu.memory_space<vmem>>, %arg13: memref<128x128xbf16, #tpu.memory_space<vmem>>, %arg14: memref<16x128xf32, #tpu.memory_space<vmem>>, %arg15: memref<16x128xbf16, #tpu.memory_space<vmem>>) attributes {dimension_semantics = [#tpu.dimension_semantics<parallel>], iteration_bounds = array<i64: 1>, scalar_prefetch = 0 : i64, scratch_operands = 0 : i64, tpu.core_type = #tpu.core_type<tc>, window_params = [{transform_indices = @transform_0, window_bounds = array<i64: 16, 32>}, {pipeline_mode = #tpu.pipeline_mode<synchronous>, transform_indices = @transform_1, window_bounds = array<i64: 1, 32>}, {pipeline_mode = #tpu.pipeline_mode<synchronous>, transform_indices = @transform_2, window_bounds = array<i64: 1, 32>}, {pipeline_mode = #tpu.pipeline_mode<synchronous>, transform_indices = @transform_3, window_bounds = array<i64: 32, 128>}, {pipeline_mode = #tpu.pipeline_mode<synchronous>, transform_indices = @transform_4, window_bounds = array<i64: 128, 128>}, {pipeline_mode = #tpu.pipeline_mode<synchronous>, transform_indices = @transform_5, window_bounds = array<i64: 128, 128>}, {pipeline_mode = #tpu.pipeline_mode<synchronous>, transform_indices = @transform_6, window_bounds = array<i64: 128, 128>}, {pipeline_mode = #tpu.pipeline_mode<synchronous>, transform_indices = @transform_7, window_bounds = array<i64: 128, 128>}, {pipeline_mode = #tpu.pipeline_mode<synchronous>, transform_indices = @transform_8, window_bounds = array<i64: 128, 128>}, {pipeline_mode = #tpu.pipeline_mode<synchronous>, transform_indices = @transform_9, window_bounds = array<i64: 1, 128>}, {pipeline_mode = #tpu.pipeline_mode<synchronous>, transform_indices = @transform_10, window_bounds = array<i64: 128, 128>}, {pipeline_mode = #tpu.pipeline_mode<synchronous>, transform_indices = @transform_11, window_bounds = array<i64: 1, 128>}, {pipeline_mode = #tpu.pipeline_mode<synchronous>, transform_indices = @transform_12, window_bounds = array<i64: 128, 128>}, {transform_indices = @transform_13, window_bounds = array<i64: 16, 128>}, {transform_indices = @transform_14, window_bounds = array<i64: 16, 128>}]} {
    %c0 = arith.constant 0 : index
    %c0_0 = arith.constant 0 : index
    %0 = vector.load %arg1[%c0, %c0_0] : memref<16x32xf32, #tpu.memory_space<vmem>>, vector<16x32xf32>
    %cst = arith.constant dense<0.000000e+00> : vector<16xf32>
    %1 = vector.multi_reduction <add>, %0, %cst [1] : vector<16x32xf32> to vector<16xf32>
    %2 = vector.shape_cast %1 : vector<16xf32> to vector<16x1xf32>
    %cst_1 = arith.constant 3.200000e+01 : f32
    %3 = vector.broadcast %cst_1 : f32 to vector<16x1xf32>
    %4 = arith.divf %2, %3 : vector<16x1xf32>
    %5 = vector.broadcast %4 : vector<16x1xf32> to vector<16x32xf32>
    %6 = arith.subf %0, %5 : vector<16x32xf32>
    %7 = arith.mulf %6, %6 : vector<16x32xf32>
    %cst_2 = arith.constant dense<0.000000e+00> : vector<16xf32>
    %8 = vector.multi_reduction <add>, %7, %cst_2 [1] : vector<16x32xf32> to vector<16xf32>
    %9 = vector.shape_cast %8 : vector<16xf32> to vector<16x1xf32>
    %cst_3 = arith.constant 3.200000e+01 : f32
    %10 = vector.broadcast %cst_3 : f32 to vector<16x1xf32>
    %11 = arith.divf %9, %10 : vector<16x1xf32>
    %12 = vector.broadcast %4 : vector<16x1xf32> to vector<16x32xf32>
    %13 = arith.subf %0, %12 : vector<16x32xf32>
    %cst_4 = arith.constant 9.99999974E-6 : f32
    %14 = vector.broadcast %cst_4 : f32 to vector<16x1xf32>
    %15 = arith.addf %11, %14 : vector<16x1xf32>
    %16 = math.rsqrt %15 : vector<16x1xf32>
    %17 = vector.broadcast %16 : vector<16x1xf32> to vector<16x32xf32>
    %18 = arith.mulf %13, %17 : vector<16x32xf32>
    %c0_5 = arith.constant 0 : index
    %c0_6 = arith.constant 0 : index
    %19 = vector.load %arg2[%c0_5, %c0_6] : memref<1x32xf32, #tpu.memory_space<vmem>>, vector<1x32xf32>
    %20 = vector.broadcast %19 : vector<1x32xf32> to vector<16x32xf32>
    %21 = arith.mulf %18, %20 : vector<16x32xf32>
    %c0_7 = arith.constant 0 : index
    %c0_8 = arith.constant 0 : index
    %22 = vector.load %arg3[%c0_7, %c0_8] : memref<1x32xf32, #tpu.memory_space<vmem>>, vector<1x32xf32>
    %23 = vector.broadcast %22 : vector<1x32xf32> to vector<16x32xf32>
    %24 = arith.addf %21, %23 : vector<16x32xf32>
    %25 = arith.truncf %24 : vector<16x32xf32> to vector<16x32xbf16>
    %c0_9 = arith.constant 0 : index
    %c0_10 = arith.constant 0 : index
    %26 = vector.load %arg4[%c0_9, %c0_10] : memref<32x128xbf16, #tpu.memory_space<vmem>>, vector<32x128xbf16>
    %cst_11 = arith.constant dense<0.000000e+00> : vector<16x128xf32>
    %27 = tpu.matmul %25, %26, %cst_11 {dimension_numbers = #tpu.dot_dimension_numbers<[1], [0], [0], [1], [0, 0, 1, 1], [], []>} : vector<16x32xbf16>, vector<32x128xbf16>, vector<16x128xf32> -> vector<16x128xf32>
    %28 = arith.truncf %27 : vector<16x128xf32> to vector<16x128xbf16>
    %c0_12 = arith.constant 0 : index
    %c0_13 = arith.constant 0 : index
    %29 = vector.load %arg5[%c0_12, %c0_13] : memref<128x128xbf16, #tpu.memory_space<vmem>>, vector<128x128xbf16>
    %cst_14 = arith.constant dense<0.000000e+00> : vector<16x128xf32>
    %30 = tpu.matmul %28, %29, %cst_14 {dimension_numbers = #tpu.dot_dimension_numbers<[1], [0], [0], [1], [0, 0, 1, 1], [], []>} : vector<16x128xbf16>, vector<128x128xbf16>, vector<16x128xf32> -> vector<16x128xf32>
    %31 = arith.truncf %30 : vector<16x128xf32> to vector<16x128xbf16>
    %c0_15 = arith.constant 0 : index
    %c0_16 = arith.constant 0 : index
    %32 = vector.load %arg15[%c0_15, %c0_16] : memref<16x128xbf16, #tpu.memory_space<vmem>>, vector<16x128xbf16>
    tpu.vector_store %arg15[%c0_15, %c0_16], %31 {strides = array<i32>} : memref<16x128xbf16, #tpu.memory_space<vmem>>, vector<16x128xbf16>,
    %33 = arith.mulf %27, %27 : vector<16x128xf32>
    %cst_17 = arith.constant dense<0.000000e+00> : vector<16xf32>
    %34 = vector.multi_reduction <add>, %33, %cst_17 [1] : vector<16x128xf32> to vector<16xf32>
    %35 = vector.shape_cast %34 : vector<16xf32> to vector<16x1xf32>
    %cst_18 = arith.constant 1.000000e-24 : f32
    %36 = vector.broadcast %cst_18 : f32 to vector<16x1xf32>
    %37 = arith.maximumf %35, %36 : vector<16x1xf32>
    %38 = math.rsqrt %37 : vector<16x1xf32>
    %39 = vector.broadcast %38 : vector<16x1xf32> to vector<16x128xf32>
    %40 = arith.mulf %27, %39 : vector<16x128xf32>
    %41 = arith.truncf %40 : vector<16x128xf32> to vector<16x128xbf16>
    %c0_19 = arith.constant 0 : index
    %c0_20 = arith.constant 0 : index
    %42 = vector.load %arg8[%c0_19, %c0_20] : memref<128x128xbf16, #tpu.memory_space<vmem>>, vector<128x128xbf16>
    %cst_21 = arith.constant dense<0.000000e+00> : vector<16x128xf32>
    %43 = tpu.matmul %41, %42, %cst_21 {dimension_numbers = #tpu.dot_dimension_numbers<[1], [0], [0], [1], [0, 0, 1, 1], [], []>} : vector<16x128xbf16>, vector<128x128xbf16>, vector<16x128xf32> -> vector<16x128xf32>
    %44 = arith.truncf %43 : vector<16x128xf32> to vector<16x128xbf16>
    %c0_22 = arith.constant 0 : index
    %c0_23 = arith.constant 0 : index
    %45 = vector.load %arg6[%c0_22, %c0_23] : memref<128x128xbf16, #tpu.memory_space<vmem>>, vector<128x128xbf16>
    %cst_24 = arith.constant dense<0.000000e+00> : vector<16x128xf32>
    %46 = tpu.matmul %44, %45, %cst_24 {dimension_numbers = #tpu.dot_dimension_numbers<[1], [0], [0], [1], [0, 0, 1, 1], [], []>} : vector<16x128xbf16>, vector<128x128xbf16>, vector<16x128xf32> -> vector<16x128xf32>
    %47 = tpu.iota {dimensions = array<i32: 1>} : vector<16x128xi32>
    %c12_i32 = arith.constant 12 : i32
    %48 = vector.broadcast %c12_i32 : i32 to vector<16x128xi32>
    %49 = arith.cmpi slt, %47, %48 : vector<16x128xi32>
    %cst_25 = arith.constant -1.000000e+30 : f32
    %50 = vector.broadcast %cst_25 : f32 to vector<16x128xf32>
    %51 = arith.select %49, %46, %50 : vector<16x128xi1>, vector<16x128xf32>
    %cst_26 = arith.constant dense<0xFF800000> : vector<16xf32>
    %52 = vector.multi_reduction <maximumf>, %51, %cst_26 [1] : vector<16x128xf32> to vector<16xf32>
    %53 = vector.shape_cast %52 : vector<16xf32> to vector<16x1xf32>
    %54 = vector.broadcast %53 : vector<16x1xf32> to vector<16x128xf32>
    %55 = arith.subf %51, %54 : vector<16x128xf32>
    %56 = math.exp %55 : vector<16x128xf32>
    %cst_27 = arith.constant dense<0.000000e+00> : vector<16xf32>
    %57 = vector.multi_reduction <add>, %56, %cst_27 [1] : vector<16x128xf32> to vector<16xf32>
    %58 = vector.shape_cast %57 : vector<16xf32> to vector<16x1xf32>
    %59 = tpu.reciprocal %58 {approx = true} : vector<16x1xf32> -> vector<16x1xf32>
    %60 = vector.broadcast %59 : vector<16x1xf32> to vector<16x128xf32>
    %61 = arith.mulf %56, %60 : vector<16x128xf32>
    %62 = arith.truncf %61 : vector<16x128xf32> to vector<16x128xbf16>
    %c0_28 = arith.constant 0 : index
    %c0_29 = arith.constant 0 : index
    %63 = vector.load %arg7[%c0_28, %c0_29] : memref<128x128xbf16, #tpu.memory_space<vmem>>, vector<128x128xbf16>
    %cst_30 = arith.constant dense<0.000000e+00> : vector<16x128xf32>
    %64 = tpu.matmul %62, %63, %cst_30 {dimension_numbers = #tpu.dot_dimension_numbers<[1], [0], [0], [1], [0, 0, 1, 1], [], []>} : vector<16x128xbf16>, vector<128x128xbf16>, vector<16x128xf32> -> vector<16x128xf32>
    %65 = arith.truncf %64 : vector<16x128xf32> to vector<16x128xbf16>
    %c0_31 = arith.constant 0 : index
    %c0_32 = arith.constant 0 : index
    %66 = vector.load %arg9[%c0_31, %c0_32] : memref<128x128xbf16, #tpu.memory_space<vmem>>, vector<128x128xbf16>
    %cst_33 = arith.constant dense<0.000000e+00> : vector<16x128xf32>
    %67 = tpu.matmul %65, %66, %cst_33 {dimension_numbers = #tpu.dot_dimension_numbers<[1], [0], [0], [1], [0, 0, 1, 1], [], []>} : vector<16x128xbf16>, vector<128x128xbf16>, vector<16x128xf32> -> vector<16x128xf32>
    %c0_34 = arith.constant 0 : index
    %c0_35 = arith.constant 0 : index
    %68 = vector.load %arg10[%c0_34, %c0_35] : memref<1x128xf32, #tpu.memory_space<vmem>>, vector<1x128xf32>
    %69 = vector.broadcast %68 : vector<1x128xf32> to vector<16x128xf32>
    %70 = arith.addf %67, %69 : vector<16x128xf32>
    %71 = arith.mulf %70, %70 : vector<16x128xf32>
    %cst_36 = arith.constant dense<0.000000e+00> : vector<16xf32>
    %72 = vector.multi_reduction <add>, %71, %cst_36 [1] : vector<16x128xf32> to vector<16xf32>
    %73 = vector.shape_cast %72 : vector<16xf32> to vector<16x1xf32>
    %cst_37 = arith.constant 1.000000e-24 : f32
    %74 = vector.broadcast %cst_37 : f32 to vector<16x1xf32>
    %75 = arith.maximumf %73, %74 : vector<16x1xf32>
    %76 = math.rsqrt %75 : vector<16x1xf32>
    %77 = vector.broadcast %76 : vector<16x1xf32> to vector<16x128xf32>
    %78 = arith.mulf %70, %77 : vector<16x128xf32>
    %cst_38 = arith.constant 0.899999976 : f32
    %79 = vector.broadcast %cst_38 : f32 to vector<16x128xf32>
    %80 = arith.mulf %79, %40 : vector<16x128xf32>
    %cst_39 = arith.constant 1.000000e-01 : f32
    %81 = vector.broadcast %cst_39 : f32 to vector<16x128xf32>
    %82 = arith.mulf %81, %78 : vector<16x128xf32>
    %83 = arith.addf %80, %82 : vector<16x128xf32>
    %84 = arith.truncf %83 : vector<16x128xf32> to vector<16x128xbf16>
    %c0_40 = arith.constant 0 : index
    %c0_41 = arith.constant 0 : index
    %85 = vector.load %arg11[%c0_40, %c0_41] : memref<128x128xbf16, #tpu.memory_space<vmem>>, vector<128x128xbf16>
    %cst_42 = arith.constant dense<0.000000e+00> : vector<16x128xf32>
    %86 = tpu.matmul %84, %85, %cst_42 {dimension_numbers = #tpu.dot_dimension_numbers<[1], [0], [0], [1], [0, 0, 1, 1], [], []>} : vector<16x128xbf16>, vector<128x128xbf16>, vector<16x128xf32> -> vector<16x128xf32>
    %c0_43 = arith.constant 0 : index
    %c0_44 = arith.constant 0 : index
    %87 = vector.load %arg12[%c0_43, %c0_44] : memref<1x128xf32, #tpu.memory_space<vmem>>, vector<1x128xf32>
    %88 = vector.broadcast %87 : vector<1x128xf32> to vector<16x128xf32>
    %89 = arith.addf %86, %88 : vector<16x128xf32>
    %90 = arith.mulf %89, %89 : vector<16x128xf32>
    %cst_45 = arith.constant dense<0.000000e+00> : vector<16xf32>
    %91 = vector.multi_reduction <add>, %90, %cst_45 [1] : vector<16x128xf32> to vector<16xf32>
    %92 = vector.shape_cast %91 : vector<16xf32> to vector<16x1xf32>
    %cst_46 = arith.constant 1.000000e-24 : f32
    %93 = vector.broadcast %cst_46 : f32 to vector<16x1xf32>
    %94 = arith.maximumf %92, %93 : vector<16x1xf32>
    %95 = math.rsqrt %94 : vector<16x1xf32>
    %96 = vector.broadcast %95 : vector<16x1xf32> to vector<16x128xf32>
    %97 = arith.mulf %89, %96 : vector<16x128xf32>
    %98 = arith.truncf %97 : vector<16x128xf32> to vector<16x128xbf16>
    %c0_47 = arith.constant 0 : index
    %c0_48 = arith.constant 0 : index
    %99 = vector.load %arg13[%c0_47, %c0_48] : memref<128x128xbf16, #tpu.memory_space<vmem>>, vector<128x128xbf16>
    %cst_49 = arith.constant dense<0.000000e+00> : vector<16x128xf32>
    %100 = tpu.matmul %98, %99, %cst_49 {dimension_numbers = #tpu.dot_dimension_numbers<[1], [0], [0], [1], [0, 0, 1, 1], [], []>} : vector<16x128xbf16>, vector<128x128xbf16>, vector<16x128xf32> -> vector<16x128xf32>
    %c0_50 = arith.constant 0 : index
    %c0_51 = arith.constant 0 : index
    %101 = vector.load %arg14[%c0_50, %c0_51] : memref<16x128xf32, #tpu.memory_space<vmem>>, vector<16x128xf32>
    tpu.vector_store %arg14[%c0_50, %c0_51], %100 {strides = array<i32>} : memref<16x128xf32, #tpu.memory_space<vmem>>, vector<16x128xf32>,
    return
  }
  func.func @transform_0(%arg0: i32) -> (i32, i32) {
    %c0_i32 = arith.constant 0 : i32
    %c0_i32_0 = arith.constant 0 : i32
    return %arg0, %c0_i32 : i32, i32
  }
  func.func @transform_1(%arg0: i32) -> (i32, i32) {
    %c0_i32 = arith.constant 0 : i32
    %c0_i32_0 = arith.constant 0 : i32
    %c0_i32_1 = arith.constant 0 : i32
    return %c0_i32, %c0_i32_0 : i32, i32
  }
  func.func @transform_2(%arg0: i32) -> (i32, i32) {
    %c0_i32 = arith.constant 0 : i32
    %c0_i32_0 = arith.constant 0 : i32
    %c0_i32_1 = arith.constant 0 : i32
    return %c0_i32, %c0_i32_0 : i32, i32
  }
  func.func @transform_3(%arg0: i32) -> (i32, i32) {
    %c0_i32 = arith.constant 0 : i32
    %c0_i32_0 = arith.constant 0 : i32
    %c0_i32_1 = arith.constant 0 : i32
    return %c0_i32, %c0_i32_0 : i32, i32
  }
  func.func @transform_4(%arg0: i32) -> (i32, i32) {
    %c0_i32 = arith.constant 0 : i32
    %c0_i32_0 = arith.constant 0 : i32
    %c0_i32_1 = arith.constant 0 : i32
    return %c0_i32, %c0_i32_0 : i32, i32
  }
  func.func @transform_5(%arg0: i32) -> (i32, i32) {
    %c0_i32 = arith.constant 0 : i32
    %c0_i32_0 = arith.constant 0 : i32
    %c0_i32_1 = arith.constant 0 : i32
    return %c0_i32, %c0_i32_0 : i32, i32
  }
  func.func @transform_6(%arg0: i32) -> (i32, i32) {
    %c0_i32 = arith.constant 0 : i32
    %c0_i32_0 = arith.constant 0 : i32
    %c0_i32_1 = arith.constant 0 : i32
    return %c0_i32, %c0_i32_0 : i32, i32
  }
  func.func @transform_7(%arg0: i32) -> (i32, i32) {
    %c0_i32 = arith.constant 0 : i32
    %c0_i32_0 = arith.constant 0 : i32
    %c0_i32_1 = arith.constant 0 : i32
    return %c0_i32, %c0_i32_0 : i32, i32
  }
  func.func @transform_8(%arg0: i32) -> (i32, i32) {
    %c0_i32 = arith.constant 0 : i32
    %c0_i32_0 = arith.constant 0 : i32
    %c0_i32_1 = arith.constant 0 : i32
    return %c0_i32, %c0_i32_0 : i32, i32
  }
  func.func @transform_9(%arg0: i32) -> (i32, i32) {
    %c0_i32 = arith.constant 0 : i32
    %c0_i32_0 = arith.constant 0 : i32
    %c0_i32_1 = arith.constant 0 : i32
    return %c0_i32, %c0_i32_0 : i32, i32
  }
  func.func @transform_10(%arg0: i32) -> (i32, i32) {
    %c0_i32 = arith.constant 0 : i32
    %c0_i32_0 = arith.constant 0 : i32
    %c0_i32_1 = arith.constant 0 : i32
    return %c0_i32, %c0_i32_0 : i32, i32
  }
  func.func @transform_11(%arg0: i32) -> (i32, i32) {
    %c0_i32 = arith.constant 0 : i32
    %c0_i32_0 = arith.constant 0 : i32
    %c0_i32_1 = arith.constant 0 : i32
    return %c0_i32, %c0_i32_0 : i32, i32
  }
  func.func @transform_12(%arg0: i32) -> (i32, i32) {
    %c0_i32 = arith.constant 0 : i32
    %c0_i32_0 = arith.constant 0 : i32
    %c0_i32_1 = arith.constant 0 : i32
    return %c0_i32, %c0_i32_0 : i32, i32
  }
  func.func @transform_13(%arg0: i32) -> (i32, i32) {
    %c0_i32 = arith.constant 0 : i32
    %c0_i32_0 = arith.constant 0 : i32
    return %arg0, %c0_i32 : i32, i32
  }
  func.func @transform_14(%arg0: i32) -> (i32, i32) {
    %c0_i32 = arith.constant 0 : i32
    %c0_i32_0 = arith.constant 0 : i32
    return %arg0, %c0_i32 : i32, i32
  }
}

module attributes {stable_mosaic.version = 11 : i64} {
  func.func @clip_head_kernel(%arg0: i32, %arg1: memref<16x32xf32, #tpu.memory_space<vmem>>, %arg2: memref<1x32xf32, #tpu.memory_space<vmem>>, %arg3: memref<1x32xf32, #tpu.memory_space<vmem>>, %arg4: memref<32x128xbf16, #tpu.memory_space<vmem>>, %arg5: memref<128x128xbf16, #tpu.memory_space<vmem>>, %arg6: memref<128x128xbf16, #tpu.memory_space<vmem>>, %arg7: memref<128x128xbf16, #tpu.memory_space<vmem>>, %arg8: memref<128x128xbf16, #tpu.memory_space<vmem>>, %arg9: memref<128x128xbf16, #tpu.memory_space<vmem>>, %arg10: memref<1x128xf32, #tpu.memory_space<vmem>>, %arg11: memref<128x128xbf16, #tpu.memory_space<vmem>>, %arg12: memref<1x128xf32, #tpu.memory_space<vmem>>, %arg13: memref<128x128xbf16, #tpu.memory_space<vmem>>, %arg14: memref<16x128xf32, #tpu.memory_space<vmem>>, %arg15: memref<16x128xbf16, #tpu.memory_space<vmem>>) attributes {dimension_semantics = [#tpu.dimension_semantics<parallel>], iteration_bounds = array<i64: 1>, scalar_prefetch = 0 : i64, scratch_operands = 0 : i64, tpu.core_type = #tpu.core_type<tc>, window_params = [{transform_indices = @transform_0, window_bounds = array<i64: 16, 32>}, {pipeline_mode = #tpu.pipeline_mode<synchronous>, transform_indices = @transform_1, window_bounds = array<i64: 1, 32>}, {pipeline_mode = #tpu.pipeline_mode<synchronous>, transform_indices = @transform_2, window_bounds = array<i64: 1, 32>}, {pipeline_mode = #tpu.pipeline_mode<synchronous>, transform_indices = @transform_3, window_bounds = array<i64: 32, 128>}, {pipeline_mode = #tpu.pipeline_mode<synchronous>, transform_indices = @transform_4, window_bounds = array<i64: 128, 128>}, {pipeline_mode = #tpu.pipeline_mode<synchronous>, transform_indices = @transform_5, window_bounds = array<i64: 128, 128>}, {pipeline_mode = #tpu.pipeline_mode<synchronous>, transform_indices = @transform_6, window_bounds = array<i64: 128, 128>}, {pipeline_mode = #tpu.pipeline_mode<synchronous>, transform_indices = @transform_7, window_bounds = array<i64: 128, 128>}, {pipeline_mode = #tpu.pipeline_mode<synchronous>, transform_indices = @transform_8, window_bounds = array<i64: 128, 128>}, {pipeline_mode = #tpu.pipeline_mode<synchronous>, transform_indices = @transform_9, window_bounds = array<i64: 1, 128>}, {pipeline_mode = #tpu.pipeline_mode<synchronous>, transform_indices = @transform_10, window_bounds = array<i64: 128, 128>}, {pipeline_mode = #tpu.pipeline_mode<synchronous>, transform_indices = @transform_11, window_bounds = array<i64: 1, 128>}, {pipeline_mode = #tpu.pipeline_mode<synchronous>, transform_indices = @transform_12, window_bounds = array<i64: 128, 128>}, {transform_indices = @transform_13, window_bounds = array<i64: 16, 128>}, {transform_indices = @transform_14, window_bounds = array<i64: 16, 128>}]} {
    %c0 = arith.constant 0 : index
    %c0_0 = arith.constant 0 : index
    %0 = vector.load %arg1[%c0, %c0_0] : memref<16x32xf32, #tpu.memory_space<vmem>>, vector<16x32xf32>
    %cst = arith.constant dense<0.000000e+00> : vector<16xf32>
    %1 = vector.multi_reduction <add>, %0, %cst [1] : vector<16x32xf32> to vector<16xf32>
    %2 = vector.shape_cast %1 : vector<16xf32> to vector<16x1xf32>
    %cst_1 = arith.constant 3.200000e+01 : f32
    %3 = vector.broadcast %cst_1 : f32 to vector<16x1xf32>
    %4 = arith.divf %2, %3 : vector<16x1xf32>
    %5 = vector.broadcast %4 : vector<16x1xf32> to vector<16x32xf32>
    %6 = arith.subf %0, %5 : vector<16x32xf32>
    %7 = arith.mulf %6, %6 : vector<16x32xf32>
    %cst_2 = arith.constant dense<0.000000e+00> : vector<16xf32>
    %8 = vector.multi_reduction <add>, %7, %cst_2 [1] : vector<16x32xf32> to vector<16xf32>
    %9 = vector.shape_cast %8 : vector<16xf32> to vector<16x1xf32>
    %cst_3 = arith.constant 3.200000e+01 : f32
    %10 = vector.broadcast %cst_3 : f32 to vector<16x1xf32>
    %11 = arith.divf %9, %10 : vector<16x1xf32>
    %12 = vector.broadcast %4 : vector<16x1xf32> to vector<16x32xf32>
    %13 = arith.subf %0, %12 : vector<16x32xf32>
    %cst_4 = arith.constant 9.99999974E-6 : f32
    %14 = vector.broadcast %cst_4 : f32 to vector<16x1xf32>
    %15 = arith.addf %11, %14 : vector<16x1xf32>
    %16 = math.rsqrt %15 : vector<16x1xf32>
    %17 = vector.broadcast %16 : vector<16x1xf32> to vector<16x32xf32>
    %18 = arith.mulf %13, %17 : vector<16x32xf32>
    %c0_5 = arith.constant 0 : index
    %c0_6 = arith.constant 0 : index
    %19 = vector.load %arg2[%c0_5, %c0_6] : memref<1x32xf32, #tpu.memory_space<vmem>>, vector<1x32xf32>
    %20 = vector.broadcast %19 : vector<1x32xf32> to vector<16x32xf32>
    %21 = arith.mulf %18, %20 : vector<16x32xf32>
    %c0_7 = arith.constant 0 : index
    %c0_8 = arith.constant 0 : index
    %22 = vector.load %arg3[%c0_7, %c0_8] : memref<1x32xf32, #tpu.memory_space<vmem>>, vector<1x32xf32>
    %23 = vector.broadcast %22 : vector<1x32xf32> to vector<16x32xf32>
    %24 = arith.addf %21, %23 : vector<16x32xf32>
    %25 = arith.truncf %24 : vector<16x32xf32> to vector<16x32xbf16>
    %c0_9 = arith.constant 0 : index
    %c0_10 = arith.constant 0 : index
    %26 = vector.load %arg4[%c0_9, %c0_10] : memref<32x128xbf16, #tpu.memory_space<vmem>>, vector<32x128xbf16>
    %cst_11 = arith.constant dense<0.000000e+00> : vector<16x128xf32>
    %27 = tpu.matmul %25, %26, %cst_11 {dimension_numbers = #tpu.dot_dimension_numbers<[1], [0], [0], [1], [0, 0, 1, 1], [], []>} : vector<16x32xbf16>, vector<32x128xbf16>, vector<16x128xf32> -> vector<16x128xf32>
    %28 = arith.truncf %27 : vector<16x128xf32> to vector<16x128xbf16>
    %c0_12 = arith.constant 0 : index
    %c0_13 = arith.constant 0 : index
    %29 = vector.load %arg5[%c0_12, %c0_13] : memref<128x128xbf16, #tpu.memory_space<vmem>>, vector<128x128xbf16>
    %cst_14 = arith.constant dense<0.000000e+00> : vector<16x128xf32>
    %30 = tpu.matmul %28, %29, %cst_14 {dimension_numbers = #tpu.dot_dimension_numbers<[1], [0], [0], [1], [0, 0, 1, 1], [], []>} : vector<16x128xbf16>, vector<128x128xbf16>, vector<16x128xf32> -> vector<16x128xf32>
    %31 = arith.truncf %30 : vector<16x128xf32> to vector<16x128xbf16>
    %c0_15 = arith.constant 0 : index
    %c0_16 = arith.constant 0 : index
    %32 = vector.load %arg15[%c0_15, %c0_16] : memref<16x128xbf16, #tpu.memory_space<vmem>>, vector<16x128xbf16>
    tpu.vector_store %arg15[%c0_15, %c0_16], %31 {strides = array<i32>} : memref<16x128xbf16, #tpu.memory_space<vmem>>, vector<16x128xbf16>,
    %33 = arith.mulf %27, %27 : vector<16x128xf32>
    %cst_17 = arith.constant dense<0.000000e+00> : vector<16xf32>
    %34 = vector.multi_reduction <add>, %33, %cst_17 [1] : vector<16x128xf32> to vector<16xf32>
    %35 = vector.shape_cast %34 : vector<16xf32> to vector<16x1xf32>
    %cst_18 = arith.constant 1.000000e-24 : f32
    %36 = vector.broadcast %cst_18 : f32 to vector<16x1xf32>
    %37 = arith.maximumf %35, %36 : vector<16x1xf32>
    %38 = math.rsqrt %37 : vector<16x1xf32>
    %39 = vector.broadcast %38 : vector<16x1xf32> to vector<16x128xf32>
    %40 = arith.mulf %27, %39 : vector<16x128xf32>
    %41 = arith.truncf %40 : vector<16x128xf32> to vector<16x128xbf16>
    %c0_19 = arith.constant 0 : index
    %c0_20 = arith.constant 0 : index
    %42 = vector.load %arg8[%c0_19, %c0_20] : memref<128x128xbf16, #tpu.memory_space<vmem>>, vector<128x128xbf16>
    %cst_21 = arith.constant dense<0.000000e+00> : vector<16x128xf32>
    %43 = tpu.matmul %41, %42, %cst_21 {dimension_numbers = #tpu.dot_dimension_numbers<[1], [0], [0], [1], [0, 0, 1, 1], [], []>} : vector<16x128xbf16>, vector<128x128xbf16>, vector<16x128xf32> -> vector<16x128xf32>
    %44 = arith.truncf %43 : vector<16x128xf32> to vector<16x128xbf16>
    %c0_22 = arith.constant 0 : index
    %c0_23 = arith.constant 0 : index
    %45 = vector.load %arg6[%c0_22, %c0_23] : memref<128x128xbf16, #tpu.memory_space<vmem>>, vector<128x128xbf16>
    %cst_24 = arith.constant dense<0.000000e+00> : vector<16x128xf32>
    %46 = tpu.matmul %44, %45, %cst_24 {dimension_numbers = #tpu.dot_dimension_numbers<[1], [0], [0], [1], [0, 0, 1, 1], [], []>} : vector<16x128xbf16>, vector<128x128xbf16>, vector<16x128xf32> -> vector<16x128xf32>
    %47 = tpu.iota {dimensions = array<i32: 1>} : vector<16x128xi32>
    %c12_i32 = arith.constant 12 : i32
    %48 = vector.broadcast %c12_i32 : i32 to vector<16x128xi32>
    %49 = arith.cmpi slt, %47, %48 : vector<16x128xi32>
    %cst_25 = arith.constant -1.000000e+30 : f32
    %50 = vector.broadcast %cst_25 : f32 to vector<16x128xf32>
    %51 = arith.select %49, %46, %50 : vector<16x128xi1>, vector<16x128xf32>
    %cst_26 = arith.constant dense<0xFF800000> : vector<16xf32>
    %52 = vector.multi_reduction <maximumf>, %51, %cst_26 [1] : vector<16x128xf32> to vector<16xf32>
    %53 = vector.shape_cast %52 : vector<16xf32> to vector<16x1xf32>
    %54 = vector.broadcast %53 : vector<16x1xf32> to vector<16x128xf32>
    %55 = arith.subf %51, %54 : vector<16x128xf32>
    %56 = math.exp %55 : vector<16x128xf32>
    %cst_27 = arith.constant dense<0.000000e+00> : vector<16xf32>
    %57 = vector.multi_reduction <add>, %56, %cst_27 [1] : vector<16x128xf32> to vector<16xf32>
    %58 = vector.shape_cast %57 : vector<16xf32> to vector<16x1xf32>
    %59 = tpu.reciprocal %58 {approx = true} : vector<16x1xf32> -> vector<16x1xf32>
    %60 = vector.broadcast %59 : vector<16x1xf32> to vector<16x128xf32>
    %61 = arith.mulf %56, %60 : vector<16x128xf32>
    %62 = arith.truncf %61 : vector<16x128xf32> to vector<16x128xbf16>
    %c0_28 = arith.constant 0 : index
    %c0_29 = arith.constant 0 : index
    %63 = vector.load %arg7[%c0_28, %c0_29] : memref<128x128xbf16, #tpu.memory_space<vmem>>, vector<128x128xbf16>
    %cst_30 = arith.constant dense<0.000000e+00> : vector<16x128xf32>
    %64 = tpu.matmul %62, %63, %cst_30 {dimension_numbers = #tpu.dot_dimension_numbers<[1], [0], [0], [1], [0, 0, 1, 1], [], []>} : vector<16x128xbf16>, vector<128x128xbf16>, vector<16x128xf32> -> vector<16x128xf32>
    %65 = arith.truncf %64 : vector<16x128xf32> to vector<16x128xbf16>
    %c0_31 = arith.constant 0 : index
    %c0_32 = arith.constant 0 : index
    %66 = vector.load %arg9[%c0_31, %c0_32] : memref<128x128xbf16, #tpu.memory_space<vmem>>, vector<128x128xbf16>
    %cst_33 = arith.constant dense<0.000000e+00> : vector<16x128xf32>
    %67 = tpu.matmul %65, %66, %cst_33 {dimension_numbers = #tpu.dot_dimension_numbers<[1], [0], [0], [1], [0, 0, 1, 1], [], []>} : vector<16x128xbf16>, vector<128x128xbf16>, vector<16x128xf32> -> vector<16x128xf32>
    %c0_34 = arith.constant 0 : index
    %c0_35 = arith.constant 0 : index
    %68 = vector.load %arg10[%c0_34, %c0_35] : memref<1x128xf32, #tpu.memory_space<vmem>>, vector<1x128xf32>
    %69 = vector.broadcast %68 : vector<1x128xf32> to vector<16x128xf32>
    %70 = arith.addf %67, %69 : vector<16x128xf32>
    %71 = arith.mulf %70, %70 : vector<16x128xf32>
    %cst_36 = arith.constant dense<0.000000e+00> : vector<16xf32>
    %72 = vector.multi_reduction <add>, %71, %cst_36 [1] : vector<16x128xf32> to vector<16xf32>
    %73 = vector.shape_cast %72 : vector<16xf32> to vector<16x1xf32>
    %cst_37 = arith.constant 1.000000e-24 : f32
    %74 = vector.broadcast %cst_37 : f32 to vector<16x1xf32>
    %75 = arith.maximumf %73, %74 : vector<16x1xf32>
    %76 = math.rsqrt %75 : vector<16x1xf32>
    %77 = vector.broadcast %76 : vector<16x1xf32> to vector<16x128xf32>
    %78 = arith.mulf %70, %77 : vector<16x128xf32>
    %cst_38 = arith.constant 0.899999976 : f32
    %79 = vector.broadcast %cst_38 : f32 to vector<16x128xf32>
    %80 = arith.mulf %79, %40 : vector<16x128xf32>
    %cst_39 = arith.constant 1.000000e-01 : f32
    %81 = vector.broadcast %cst_39 : f32 to vector<16x128xf32>
    %82 = arith.mulf %81, %78 : vector<16x128xf32>
    %83 = arith.addf %80, %82 : vector<16x128xf32>
    %84 = arith.truncf %83 : vector<16x128xf32> to vector<16x128xbf16>
    %c0_40 = arith.constant 0 : index
    %c0_41 = arith.constant 0 : index
    %85 = vector.load %arg11[%c0_40, %c0_41] : memref<128x128xbf16, #tpu.memory_space<vmem>>, vector<128x128xbf16>
    %cst_42 = arith.constant dense<0.000000e+00> : vector<16x128xf32>
    %86 = tpu.matmul %84, %85, %cst_42 {dimension_numbers = #tpu.dot_dimension_numbers<[1], [0], [0], [1], [0, 0, 1, 1], [], []>} : vector<16x128xbf16>, vector<128x128xbf16>, vector<16x128xf32> -> vector<16x128xf32>
    %c0_43 = arith.constant 0 : index
    %c0_44 = arith.constant 0 : index
    %87 = vector.load %arg12[%c0_43, %c0_44] : memref<1x128xf32, #tpu.memory_space<vmem>>, vector<1x128xf32>
    %88 = vector.broadcast %87 : vector<1x128xf32> to vector<16x128xf32>
    %89 = arith.addf %86, %88 : vector<16x128xf32>
    %90 = arith.mulf %89, %89 : vector<16x128xf32>
    %cst_45 = arith.constant dense<0.000000e+00> : vector<16xf32>
    %91 = vector.multi_reduction <add>, %90, %cst_45 [1] : vector<16x128xf32> to vector<16xf32>
    %92 = vector.shape_cast %91 : vector<16xf32> to vector<16x1xf32>
    %cst_46 = arith.constant 1.000000e-24 : f32
    %93 = vector.broadcast %cst_46 : f32 to vector<16x1xf32>
    %94 = arith.maximumf %92, %93 : vector<16x1xf32>
    %95 = math.rsqrt %94 : vector<16x1xf32>
    %96 = vector.broadcast %95 : vector<16x1xf32> to vector<16x128xf32>
    %97 = arith.mulf %89, %96 : vector<16x128xf32>
    %98 = arith.truncf %97 : vector<16x128xf32> to vector<16x128xbf16>
    %c0_47 = arith.constant 0 : index
    %c0_48 = arith.constant 0 : index
    %99 = vector.load %arg13[%c0_47, %c0_48] : memref<128x128xbf16, #tpu.memory_space<vmem>>, vector<128x128xbf16>
    %cst_49 = arith.constant dense<0.000000e+00> : vector<16x128xf32>
    %100 = tpu.matmul %98, %99, %cst_49 {dimension_numbers = #tpu.dot_dimension_numbers<[1], [0], [0], [1], [0, 0, 1, 1], [], []>} : vector<16x128xbf16>, vector<128x128xbf16>, vector<16x128xf32> -> vector<16x128xf32>
    %c0_50 = arith.constant 0 : index
    %c0_51 = arith.constant 0 : index
    %101 = vector.load %arg14[%c0_50, %c0_51] : memref<16x128xf32, #tpu.memory_space<vmem>>, vector<16x128xf32>
    tpu.vector_store %arg14[%c0_50, %c0_51], %100 {strides = array<i32>} : memref<16x128xf32, #tpu.memory_space<vmem>>, vector<16x128xf32>,
    return
  }
  func.func @transform_0(%arg0: i32) -> (i32, i32) {
    %c0_i32 = arith.constant 0 : i32
    %c0_i32_0 = arith.constant 0 : i32
    return %arg0, %c0_i32 : i32, i32
  }
  func.func @transform_1(%arg0: i32) -> (i32, i32) {
    %c0_i32 = arith.constant 0 : i32
    %c0_i32_0 = arith.constant 0 : i32
    %c0_i32_1 = arith.constant 0 : i32
    return %c0_i32, %c0_i32_0 : i32, i32
  }
  func.func @transform_2(%arg0: i32) -> (i32, i32) {
    %c0_i32 = arith.constant 0 : i32
    %c0_i32_0 = arith.constant 0 : i32
    %c0_i32_1 = arith.constant 0 : i32
    return %c0_i32, %c0_i32_0 : i32, i32
  }
  func.func @transform_3(%arg0: i32) -> (i32, i32) {
    %c0_i32 = arith.constant 0 : i32
    %c0_i32_0 = arith.constant 0 : i32
    %c0_i32_1 = arith.constant 0 : i32
    return %c0_i32, %c0_i32_0 : i32, i32
  }
  func.func @transform_4(%arg0: i32) -> (i32, i32) {
    %c0_i32 = arith.constant 0 : i32
    %c0_i32_0 = arith.constant 0 : i32
    %c0_i32_1 = arith.constant 0 : i32
    return %c0_i32, %c0_i32_0 : i32, i32
  }
  func.func @transform_5(%arg0: i32) -> (i32, i32) {
    %c0_i32 = arith.constant 0 : i32
    %c0_i32_0 = arith.constant 0 : i32
    %c0_i32_1 = arith.constant 0 : i32
    return %c0_i32, %c0_i32_0 : i32, i32
  }
  func.func @transform_6(%arg0: i32) -> (i32, i32) {
    %c0_i32 = arith.constant 0 : i32
    %c0_i32_0 = arith.constant 0 : i32
    %c0_i32_1 = arith.constant 0 : i32
    return %c0_i32, %c0_i32_0 : i32, i32
  }
  func.func @transform_7(%arg0: i32) -> (i32, i32) {
    %c0_i32 = arith.constant 0 : i32
    %c0_i32_0 = arith.constant 0 : i32
    %c0_i32_1 = arith.constant 0 : i32
    return %c0_i32, %c0_i32_0 : i32, i32
  }
  func.func @transform_8(%arg0: i32) -> (i32, i32) {
    %c0_i32 = arith.constant 0 : i32
    %c0_i32_0 = arith.constant 0 : i32
    %c0_i32_1 = arith.constant 0 : i32
    return %c0_i32, %c0_i32_0 : i32, i32
  }
  func.func @transform_9(%arg0: i32) -> (i32, i32) {
    %c0_i32 = arith.constant 0 : i32
    %c0_i32_0 = arith.constant 0 : i32
    %c0_i32_1 = arith.constant 0 : i32
    return %c0_i32, %c0_i32_0 : i32, i32
  }
  func.func @transform_10(%arg0: i32) -> (i32, i32) {
    %c0_i32 = arith.constant 0 : i32
    %c0_i32_0 = arith.constant 0 : i32
    %c0_i32_1 = arith.constant 0 : i32
    return %c0_i32, %c0_i32_0 : i32, i32
  }
  func.func @transform_11(%arg0: i32) -> (i32, i32) {
    %c0_i32 = arith.constant 0 : i32
    %c0_i32_0 = arith.constant 0 : i32
    %c0_i32_1 = arith.constant 0 : i32
    return %c0_i32, %c0_i32_0 : i32, i32
  }
  func.func @transform_12(%arg0: i32) -> (i32, i32) {
    %c0_i32 = arith.constant 0 : i32
    %c0_i32_0 = arith.constant 0 : i32
    %c0_i32_1 = arith.constant 0 : i32
    return %c0_i32, %c0_i32_0 : i32, i32
  }
  func.func @transform_13(%arg0: i32) -> (i32, i32) {
    %c0_i32 = arith.constant 0 : i32
    %c0_i32_0 = arith.constant 0 : i32
    return %arg0, %c0_i32 : i32, i32
  }
  func.func @transform_14(%arg0: i32) -> (i32, i32) {
    %c0_i32 = arith.constant 0 : i32
    %c0_i32_0 = arith.constant 0 : i32
    return %arg0, %c0_i32 : i32, i32
  }
}

</mosaic_0001>

<bundles_post_ra>
// kernel: tpu_custom_call.1
= control target key start
LH: loop header
LB: loop body
LE: loop exit
PB: predicated region body
PF: predicated region fallthrough
CT: control target
= control target key end

     0   :  { %20 = vsyncpa [#allocation3], 0  ;;  %s2345_s0 = inlined_call_operand.hbm [shape: f32[16,32], index: 0, kind: input, shape index: {}]   ;;  %s2346_s1 = inlined_call_operand.hbm [shape: f32[1,32], index: 1, kind: input, shape index: {}]   ;;  %s2347_s2 = inlined_call_operand.hbm [shape: f32[1,32], index: 2, kind: input, shape index: {}]   ;;  %s2348_s3 = inlined_call_operand.hbm [shape: bf16[32,128], index: 3, kind: input, shape index: {}]   ;;  %s2349_s4 = inlined_call_operand.hbm [shape: bf16[128,128], index: 4, kind: input, shape index: {}]   ;;  %s2350_s5 = inlined_call_operand.hbm [shape: bf16[128,128], index: 5, kind: input, shape index: {}]   ;;  %s2351_s6 = inlined_call_operand.hbm [shape: bf16[128,128], index: 6, kind: input, shape index: {}]   ;;  %s2352_s7 = inlined_call_operand.hbm [shape: bf16[128,128], index: 7, kind: input, shape index: {}]   ;;  %s2353_s8 = inlined_call_operand.hbm [shape: bf16[128,128], index: 8, kind: input, shape index: {}]   ;;  %s2354_s9 = inlined_call_operand.hbm [shape: f32[1,128], index: 9, kind: input, shape index: {}]   ;;  %s2355_s10 = inlined_call_operand.hbm [shape: bf16[128,128], index: 10, kind: input, shape index: {}]   ;;  %s2356_s11 = inlined_call_operand.hbm [shape: f32[1,128], index: 11, kind: input, shape index: {}]   ;;  %s2357_s12 = inlined_call_operand.hbm [shape: bf16[128,128], index: 12, kind: input, shape index: {}]   ;;  %s2358_s13 = inlined_call_operand.hbm [shape: f32[16,128], index: 13, kind: output, shape index: {0}]   ;;  %s2359_s14 = inlined_call_operand.hbm [shape: bf16[16,128], index: 14, kind: output, shape index: {1}]  }
   0x1   :  { %21 = vsyncpa [#allocation6], 0 }
   0x2   :  { %22 = vsyncpa [#allocation9], 0 }
   0x3   :  { %23 = vsyncpa [#allocation12], 0 }
   0x4   :  { %24 = vsyncpa [#allocation15], 0 }
   0x5   :  { %25 = vsyncpa [#allocation18], 0 }
   0x6   :  { %26 = vsyncpa [#allocation21], 0 }
   0x7   :  { %27 = vsyncpa [#allocation4], 0 }
   0x8   :  { %28 = vsyncpa [#allocation25], 0  ;;  %s1935_s29 = smov [#allocation5]   ;;  %s1936_s15 = smov [#allocation8]  }
   0x9   :  { %s47_s30 = sshll.u32 %s1935_s29, 4  ;;  %s66_s16 = sshll.u32 %s1936_s15, 4  ;;  %s48_s30 = int_to_ptr.vmem [resolvable:$true] %s47_s30  ;;  %s2031_s16 = int_to_ptr.vmem [resolvable:$true] %s66_s16 }
   0xa   :  { %s1587_s19 = scalar_lea.hbm %s2346_s1, 16 }
   0xb   :  { %p1588_p0 = scmp.ne.s32.totalorder %s2346_s1, %s1587_s19  ;;  %p1591_p1 = scmp.lt.u32.totalorder %s1587_s19, %s2346_s1 }
   0xd   :  { %p1593_p2 = pnand %p1591_p1, %p1588_p0 }
   0xf   :  { %1596 = shalt.err (!%p1593_p2)
}
  0x10   :  { %s1597_s24 = scalar_lea.vmem %s48_s30, 16  ;;  %s1601_s25 = scalar_lea.vmem %s48_s30, 32 }
  0x11   :  { %p1598_p3 = scmp.ne.s32.totalorder %s48_s30, %s1597_s24  ;;  %p1602_p4 = scmp.lt.s32.totalorder %s48_s30, %s48_s30 }
  0x12   :  { %p1603_p5 = scmp.lt.s32.totalorder %s1601_s25, %s1597_s24 }
  0x14   :  { %p1604_p6 = por %p1603_p5, %p1602_p4 }
  0x16   :  { %p1605_p7 = pnand %p1604_p6, %p1598_p3 }
  0x18   :  { %1608 = shalt.err (!%p1605_p7)
}
  0x19   :  { %50 = dma.hbm_to_vmem [thread:$0]  %s2346_s1, 16, %s48_s30, [#allocation6]  }
  0x1a   :  { %s1609_s15 = scalar_lea.hbm %s2348_s3, 256 }
  0x1b   :  { %p1610_p8 = scmp.ne.s32.totalorder %s2348_s3, %s1609_s15  ;;  %p1613_p9 = scmp.lt.u32.totalorder %s1609_s15, %s2348_s3 }
  0x1d   :  { %p1615_p10 = pnand %p1613_p9, %p1610_p8 }
  0x1f   :  { %1618 = shalt.err (!%p1615_p10)
}
  0x20   :  { %s1619_s21 = scalar_lea.vmem %s2031_s16, 256  ;;  %p1624_p12 = scmp.lt.s32.totalorder %s2031_s16, %s2031_s16 }
  0x21   :  { %p1620_p11 = scmp.ne.s32.totalorder %s2031_s16, %s1619_s21  ;;  %p1625_p13 = scmp.lt.s32.totalorder %s1619_s21, %s1619_s21 }
  0x23   :  { %p1626_p0 = por %p1625_p13, %p1624_p12 }
  0x25   :  { %p1627_p1 = pnand %p1626_p0, %p1620_p11 }
  0x27   :  { %1630 = shalt.err (!%p1627_p1)
}
  0x28   :  { %s1937_s1 = smov 64   ;;  %s1938_s30 = smov 4  }
  0x29   :  { %72 = dma.hbm_to_vmem [thread:$0]  %s2348_s3, 256, %s2031_s16, [#allocation9], %s1937_s1, %s1937_s1, %s1938_s30  }
  0x2a   :  { %s1939_s24 = smov [#allocation11]   ;;  %s1940_s26 = smov [#allocation14]  }
  0x2b   :  { %s90_s25 = sshll.u32 %s1939_s24, 4  ;;  %s114_s27 = sshll.u32 %s1940_s26, 4  ;;  %s91_s25 = int_to_ptr.vmem [resolvable:$true] %s90_s25  ;;  %s2065_s27 = int_to_ptr.vmem [resolvable:$true] %s114_s27 }
  0x2c   :  { %s1631_s15 = scalar_lea.hbm %s2350_s5, 1024 }
  0x2d   :  { %p1632_p2 = scmp.ne.s32.totalorder %s2350_s5, %s1631_s15  ;;  %p1635_p3 = scmp.lt.u32.totalorder %s1631_s15, %s2350_s5 }
  0x2f   :  { %p1637_p4 = pnand %p1635_p3, %p1632_p2 }
  0x31   :  { %1640 = shalt.err (!%p1637_p4)
}
  0x32   :  { %s1641_s3 = scalar_lea.vmem %s91_s25, 1024  ;;  %p1646_p6 = scmp.lt.s32.totalorder %s91_s25, %s91_s25 }
  0x33   :  { %p1642_p5 = scmp.ne.s32.totalorder %s91_s25, %s1641_s3  ;;  %p1647_p7 = scmp.lt.s32.totalorder %s1641_s3, %s1641_s3 }
  0x35   :  { %p1648_p8 = por %p1647_p7, %p1646_p6 }
  0x37   :  { %p1649_p9 = pnand %p1648_p8, %p1642_p5 }
  0x39   :  { %1652 = shalt.err (!%p1649_p9)
}
  0x3a   :  { %96 = dma.hbm_to_vmem [thread:$0]  %s2350_s5, 1024, %s91_s25, [#allocation12], %s1937_s1, %s1937_s1, %s1938_s30  }
  0x3b   :  { %s1653_s24 = scalar_lea.hbm %s2352_s7, 1024 }
  0x3c   :  { %p1654_p10 = scmp.ne.s32.totalorder %s2352_s7, %s1653_s24  ;;  %p1657_p11 = scmp.lt.u32.totalorder %s1653_s24, %s2352_s7 }
  0x3e   :  { %p1659_p12 = pnand %p1657_p11, %p1654_p10 }
  0x40   :  { %1662 = shalt.err (!%p1659_p12)
}
  0x41   :  { %s1663_s17 = scalar_lea.vmem %s2065_s27, 1024  ;;  %p1668_p0 = scmp.lt.s32.totalorder %s2065_s27, %s2065_s27 }
  0x42   :  { %p1664_p13 = scmp.ne.s32.totalorder %s2065_s27, %s1663_s17  ;;  %p1669_p1 = scmp.lt.s32.totalorder %s1663_s17, %s1663_s17 }
  0x44   :  { %p1670_p2 = por %p1669_p1, %p1668_p0 }
  0x46   :  { %p1671_p3 = pnand %p1670_p2, %p1664_p13 }
  0x48   :  { %1674 = shalt.err (!%p1671_p3)
}
  0x49   :  { %120 = dma.hbm_to_vmem [thread:$0]  %s2352_s7, 1024, %s2065_s27, [#allocation15], %s1937_s1, %s1937_s1, %s1938_s30  }
  0x4a   :  { %s1941_s18 = smov [#allocation17]   ;;  %s1942_s20 = smov [#allocation20]  }
  0x4b   :  { %s139_s19 = sshll.u32 %s1941_s18, 4  ;;  %s161_s3 = sshll.u32 %s1942_s20, 4  ;;  %s140_s19 = int_to_ptr.vmem [resolvable:$true] %s139_s19  ;;  %s162_s3 = int_to_ptr.vmem [resolvable:$true] %s161_s3 }
  0x4c   :  { %s1675_s22 = scalar_lea.hbm %s2354_s9, 16 }
  0x4d   :  { %p1676_p4 = scmp.ne.s32.totalorder %s2354_s9, %s1675_s22  ;;  %p1679_p5 = scmp.lt.u32.totalorder %s1675_s22, %s2354_s9 }
  0x4f   :  { %p1681_p6 = pnand %p1679_p5, %p1676_p4 }
  0x51   :  { %1684 = shalt.err (!%p1681_p6)
}
  0x52   :  { %s1685_s7 = scalar_lea.vmem %s140_s19, 16  ;;  %s1689_s27 = scalar_lea.vmem %s140_s19, 32 }
  0x53   :  { %p1686_p7 = scmp.ne.s32.totalorder %s140_s19, %s1685_s7  ;;  %p1690_p8 = scmp.lt.s32.totalorder %s140_s19, %s140_s19 }
  0x54   :  { %p1691_p9 = scmp.lt.s32.totalorder %s1689_s27, %s1685_s7 }
  0x56   :  { %p1692_p10 = por %p1691_p9, %p1690_p8 }
  0x58   :  { %p1693_p11 = pnand %p1692_p10, %p1686_p7 }
  0x5a   :  { %1696 = shalt.err (!%p1693_p11)
}
  0x5b   :  { %142 = dma.hbm_to_vmem [thread:$0]  %s2354_s9, 16, %s140_s19, [#allocation18]  }
  0x5c   :  { %s1697_s25 = scalar_lea.hbm %s2356_s11, 16 }
  0x5d   :  { %p1698_p12 = scmp.ne.s32.totalorder %s2356_s11, %s1697_s25  ;;  %p1701_p13 = scmp.lt.u32.totalorder %s1697_s25, %s2356_s11 }
  0x5f   :  { %p1703_p0 = pnand %p1701_p13, %p1698_p12 }
  0x61   :  { %1706 = shalt.err (!%p1703_p0)
}
  0x62   :  { %s1707_s22 = scalar_lea.vmem %s162_s3, 16  ;;  %s1711_s23 = scalar_lea.vmem %s162_s3, 32 }
  0x63   :  { %p1708_p1 = scmp.ne.s32.totalorder %s162_s3, %s1707_s22  ;;  %p1712_p2 = scmp.lt.s32.totalorder %s162_s3, %s162_s3 }
  0x64   :  { %p1713_p3 = scmp.lt.s32.totalorder %s1711_s23, %s1707_s22 }
  0x66   :  { %p1714_p4 = por %p1713_p3, %p1712_p2 }
  0x68   :  { %p1715_p5 = pnand %p1714_p4, %p1708_p1 }
  0x6a   :  { %1718 = shalt.err (!%p1715_p5)
}
  0x6b   :  { %164 = dma.hbm_to_vmem [thread:$0]  %s2356_s11, 16, %s162_s3, [#allocation21]  }
  0x6c   :  { %s1943_s24 = smov [#allocation2]   ;;  %s1719_s27 = scalar_lea.hbm %s2345_s0, 256 }
  0x6d   :  { %s34_s26 = sshll.u32 %s1943_s24, 4  ;;  %p1720_p6 = scmp.ne.s32.totalorder %s2345_s0, %s1719_s27  ;;  %s35_s26 = int_to_ptr.vmem [resolvable:$true] %s34_s26 }
  0x6e   :  { %p1723_p7 = scmp.lt.u32.totalorder %s1719_s27, %s2345_s0 }
  0x70   :  { %p1725_p8 = pnand %p1723_p7, %p1720_p6 }
  0x72   :  { %1728 = shalt.err (!%p1725_p8)
}
  0x73   :  { %s1729_s25 = scalar_lea.vmem %s35_s26, 256  ;;  %p1734_p10 = scmp.lt.s32.totalorder %s35_s26, %s35_s26 }
  0x74   :  { %p1730_p9 = scmp.ne.s32.totalorder %s35_s26, %s1729_s25  ;;  %p1735_p11 = scmp.lt.s32.totalorder %s1729_s25, %s1729_s25 }
  0x76   :  { %p1736_p12 = por %p1735_p11, %p1734_p10 }
  0x78   :  { %p1737_p13 = pnand %p1736_p12, %p1730_p9 }
  0x7a   :  { %1740 = shalt.err (!%p1737_p13)
}
  0x7b   :  { %s1944_s11 = smov 128   ;;  %s1945_s3 = smov 8  }
  0x7c   :  { %40 = dma.hbm_to_vmem [thread:$0]  %s2345_s0, 256, %s35_s26, [#allocation3], %s1944_s11, %s1944_s11, %s1945_s3  }
  0x7d   :  { %s1946_s16 = smov [#allocation7]   ;;  %s1947_s22 = smov [#allocation10]  }
  0x7e   :  { %s57_s21 = sshll.u32 %s1946_s16, 4  ;;  %s78_s23 = sshll.u32 %s1947_s22, 4  ;;  %s58_s21 = int_to_ptr.vmem [resolvable:$true] %s57_s21  ;;  %s79_s23 = int_to_ptr.vmem [resolvable:$true] %s78_s23 }
  0x7f   :  { %s1741_s24 = scalar_lea.hbm %s2347_s2, 16 }
  0x80   :  { %p1742_p0 = scmp.ne.s32.totalorder %s2347_s2, %s1741_s24  ;;  %p1745_p1 = scmp.lt.u32.totalorder %s1741_s24, %s2347_s2 }
  0x82   :  { %p1747_p2 = pnand %p1745_p1, %p1742_p0 }
  0x84   :  { %1750 = shalt.err (!%p1747_p2)
}
  0x85   :  { %s1751_s0 = scalar_lea.vmem %s58_s21, 16  ;;  %s1755_s26 = scalar_lea.vmem %s58_s21, 32 }
  0x86   :  { %p1752_p3 = scmp.ne.s32.totalorder %s58_s21, %s1751_s0  ;;  %p1756_p4 = scmp.lt.s32.totalorder %s58_s21, %s58_s21 }
  0x87   :  { %p1757_p5 = scmp.lt.s32.totalorder %s1755_s26, %s1751_s0 }
  0x89   :  { %p1758_p6 = por %p1757_p5, %p1756_p4 }
  0x8b   :  { %p1759_p7 = pnand %p1758_p6, %p1752_p3 }
  0x8d   :  { %1762 = shalt.err (!%p1759_p7)
}
  0x8e   :  { %60 = dma.hbm_to_vmem [thread:$0]  %s2347_s2, 16, %s58_s21, [#allocation6]  }
  0x8f   :  { %s1763_s18 = scalar_lea.hbm %s2349_s4, 1024 }
  0x90   :  { %p1764_p8 = scmp.ne.s32.totalorder %s2349_s4, %s1763_s18  ;;  %p1767_p9 = scmp.lt.u32.totalorder %s1763_s18, %s2349_s4 }
  0x92   :  { %p1769_p10 = pnand %p1767_p9, %p1764_p8 }
  0x94   :  { %1772 = shalt.err (!%p1769_p10)
}
  0x95   :  { %s1773_s19 = scalar_lea.vmem %s79_s23, 1024  ;;  %p1778_p12 = scmp.lt.s32.totalorder %s79_s23, %s79_s23 }
  0x96   :  { %p1774_p11 = scmp.ne.s32.totalorder %s79_s23, %s1773_s19  ;;  %p1779_p13 = scmp.lt.s32.totalorder %s1773_s19, %s1773_s19 }
  0x98   :  { %p1780_p0 = por %p1779_p13, %p1778_p12 }
  0x9a   :  { %p1781_p1 = pnand %p1780_p0, %p1774_p11 }
  0x9c   :  { %1784 = shalt.err (!%p1781_p1)
}
  0x9d   :  { %84 = dma.hbm_to_vmem [thread:$0]  %s2349_s4, 1024, %s79_s23, [#allocation9], %s1937_s1, %s1937_s1, %s1938_s30  }
  0x9e   :  { %s1948_s24 = smov [#allocation13]   ;;  %s1949_s7 = smov [#allocation16]  }
  0x9f   :  { %s102_s28 = sshll.u32 %s1948_s24, 4  ;;  %s126_s27 = sshll.u32 %s1949_s7, 4  ;;  %s103_s28 = int_to_ptr.vmem [resolvable:$true] %s102_s28  ;;  %s127_s27 = int_to_ptr.vmem [resolvable:$true] %s126_s27 }
  0xa0   :  { %s1785_s26 = scalar_lea.hbm %s2351_s6, 1024 }
  0xa1   :  { %p1786_p2 = scmp.ne.s32.totalorder %s2351_s6, %s1785_s26  ;;  %p1789_p3 = scmp.lt.u32.totalorder %s1785_s26, %s2351_s6 }
  0xa3   :  { %p1791_p4 = pnand %p1789_p3, %p1786_p2 }
  0xa5   :  { %1794 = shalt.err (!%p1791_p4)
}
  0xa6   :  { %s1795_s4 = scalar_lea.vmem %s103_s28, 1024  ;;  %p1800_p6 = scmp.lt.s32.totalorder %s103_s28, %s103_s28 }
  0xa7   :  { %p1796_p5 = scmp.ne.s32.totalorder %s103_s28, %s1795_s4  ;;  %p1801_p7 = scmp.lt.s32.totalorder %s1795_s4, %s1795_s4 }
  0xa9   :  { %p1802_p8 = por %p1801_p7, %p1800_p6 }
  0xab   :  { %p1803_p9 = pnand %p1802_p8, %p1796_p5 }
  0xad   :  { %1806 = shalt.err (!%p1803_p9)
}
  0xae   :  { %108 = dma.hbm_to_vmem [thread:$0]  %s2351_s6, 1024, %s103_s28, [#allocation12], %s1937_s1, %s1937_s1, %s1938_s30  }
  0xaf   :  { %s1807_s22 = scalar_lea.hbm %s2353_s8, 1024 }
  0xb0   :  { %p1808_p10 = scmp.ne.s32.totalorder %s2353_s8, %s1807_s22  ;;  %p1811_p11 = scmp.lt.u32.totalorder %s1807_s22, %s2353_s8 }
  0xb2   :  { %p1813_p12 = pnand %p1811_p11, %p1808_p10 }
  0xb4   :  { %1816 = shalt.err (!%p1813_p12)
}
  0xb5   :  { %s1817_s24 = scalar_lea.vmem %s127_s27, 1024  ;;  %p1822_p0 = scmp.lt.s32.totalorder %s127_s27, %s127_s27 }
  0xb6   :  { %p1818_p13 = scmp.ne.s32.totalorder %s127_s27, %s1817_s24  ;;  %p1823_p1 = scmp.lt.s32.totalorder %s1817_s24, %s1817_s24 }
  0xb8   :  { %p1824_p2 = por %p1823_p1, %p1822_p0 }
  0xba   :  { %p1825_p3 = pnand %p1824_p2, %p1818_p13 }
  0xbc   :  { %1828 = shalt.err (!%p1825_p3)
}
  0xbd   :  { %132 = dma.hbm_to_vmem [thread:$0]  %s2353_s8, 1024, %s127_s27, [#allocation15], %s1937_s1, %s1937_s1, %s1938_s30  }
  0xbe   :  { %s1950_s7 = smov [#allocation19]   ;;  %s1951_s0 = smov [#allocation22]  }
  0xbf   :  { %s148_s29 = sshll.u32 %s1950_s7, 4  ;;  %s170_s26 = sshll.u32 %s1951_s0, 4  ;;  %s149_s29 = int_to_ptr.vmem [resolvable:$true] %s148_s29  ;;  %s171_s26 = int_to_ptr.vmem [resolvable:$true] %s170_s26 }
  0xc0   :  { %s1829_s5 = scalar_lea.hbm %s2355_s10, 1024 }
  0xc1   :  { %p1830_p4 = scmp.ne.s32.totalorder %s2355_s10, %s1829_s5  ;;  %p1833_p5 = scmp.lt.u32.totalorder %s1829_s5, %s2355_s10 }
  0xc3   :  { %p1835_p6 = pnand %p1833_p5, %p1830_p4 }
  0xc5   :  { %1838 = shalt.err (!%p1835_p6)
}
  0xc6   :  { %s1839_s8 = scalar_lea.vmem %s149_s29, 1024  ;;  %p1844_p8 = scmp.lt.s32.totalorder %s149_s29, %s149_s29 }
  0xc7   :  { %p1840_p7 = scmp.ne.s32.totalorder %s149_s29, %s1839_s8  ;;  %p1845_p9 = scmp.lt.s32.totalorder %s1839_s8, %s1839_s8 }
  0xc9   :  { %p1846_p10 = por %p1845_p9, %p1844_p8 }
  0xcb   :  { %p1847_p11 = pnand %p1846_p10, %p1840_p7 }
  0xcd   :  { %1850 = shalt.err (!%p1847_p11)
}
  0xce   :  { %154 = dma.hbm_to_vmem [thread:$0]  %s2355_s10, 1024, %s149_s29, [#allocation18], %s1937_s1, %s1937_s1, %s1938_s30  }
  0xcf   :  { %s1851_s9 = scalar_lea.hbm %s2357_s12, 1024 }
  0xd0   :  { %p1852_p12 = scmp.ne.s32.totalorder %s2357_s12, %s1851_s9  ;;  %p1855_p13 = scmp.lt.u32.totalorder %s1851_s9, %s2357_s12 }
  0xd2   :  { %p1857_p0 = pnand %p1855_p13, %p1852_p12 }
  0xd4   :  { %1860 = shalt.err (!%p1857_p0)
}
  0xd5   :  { %s1861_s6 = scalar_lea.vmem %s171_s26, 1024  ;;  %p1866_p2 = scmp.lt.s32.totalorder %s171_s26, %s171_s26 }
  0xd6   :  { %p1862_p1 = scmp.ne.s32.totalorder %s171_s26, %s1861_s6  ;;  %p1867_p3 = scmp.lt.s32.totalorder %s1861_s6, %s1861_s6 }
  0xd8   :  { %p1868_p4 = por %p1867_p3, %p1866_p2 }
  0xda   :  { %p1869_p5 = pnand %p1868_p4, %p1862_p1 }
  0xdc   :  { %1872 = shalt.err (!%p1869_p5)
}
  0xdd   :  { %176 = dma.hbm_to_vmem [thread:$0]  %s2357_s12, 1024, %s171_s26, [#allocation21], %s1937_s1, %s1937_s1, %s1938_s30  }
  0xde   :  { %1917 = dma.done.wait [#allocation3], 256  }
  0xdf   :  { %1918 = vsyncadd [#allocation3], 4294967040 }
  0xe0   :  { %1919 = dma.done.wait [#allocation6], 32  }
  0xe1   :  { %1920 = vsyncadd [#allocation6], 4294967264 }
  0xe2   :  { %1921 = dma.done.wait [#allocation9], 1280  }
  0xe3   :  { %1922 = vsyncadd [#allocation9], 4294966016 }
  0xe4   :  { %1923 = dma.done.wait [#allocation12], 2048  }
  0xe5   :  { %1924 = vsyncadd [#allocation12], 4294965248 }
  0xe6   :  { %1925 = dma.done.wait [#allocation15], 2048  }
  0xe7   :  { %1926 = vsyncadd [#allocation15], 4294965248 }
  0xe8   :  { %1927 = dma.done.wait [#allocation18], 1040  }
  0xe9   :  { %1928 = vsyncadd [#allocation18], 4294966256 }
  0xea   :  { %1929 = dma.done.wait [#allocation21], 1040  }
  0xeb   :  { %1930 = vsyncadd [#allocation21], 4294966256  ;;  %vm219_vm0 = vcmask 261120   ;;  %v217_v0 = vld [vmem:[#allocation2] sm:$0xff]  ;;  %v218_v1 = vld [vmem:[#allocation2 + $0x8] sm:$0xff]  ;;  %v1952_v15 = vmov 0.0  }
  0xec   :  { %v220_v2 = vsel %vm219_vm0, %v217_v0, 0.0  ;;  %v223_v3 = vsel %vm219_vm0, %v218_v1, 0.0  ;;  %v1505_v14 = vld [vmem:[#allocation8] sm:$0xff]   ;;  %1336 = vmatprep.subr.bf16.mxu0 %v1952_v15  ;;  %1344 = vmatprep.subr.bf16.mxu1 %v1952_v15  ;;  %v1506_v16 = vld [vmem:[#allocation8 + $0x8] sm:$0xff]   ;;  %vm1953_vm1 = vmmov 0   ;;  %v1507_v17 = vld [vmem:[#allocation10] sm:$0xff]  }
  0xed   :  { %221 = vadd.xlane.f32.xlu0 %v220_v2  ;;  %1337 = vmatpush3.bf16.msra.mxu0 %v1505_v14  ;;  %v1508_v18 = vld [vmem:[#allocation10 + $0x8] sm:$0xff]   ;;  %v1509_v19 = vld [vmem:[#allocation10 + $0x10] sm:$0xff]   ;;  %v1510_v20 = vld [vmem:[#allocation10 + $0x18] sm:$0xff]   ;;  %s1954_s12 = smov [#allocation24]  }
  0xee   :  { %1340 = vmatprep.mubr.msk.bf16.mxu0 %vm1953_vm1, %v1952_v15  ;;  %1338 = vmatprep.subr.bf16.mxu0 %v1952_v15  ;;  %v1511_v21 = vld [vmem:[#allocation10 + $0x20] sm:$0xff]   ;;  %v1512_v22 = vld [vmem:[#allocation10 + $0x28] sm:$0xff]   ;;  %v1513_v23 = vld [vmem:[#allocation10 + $0x30] sm:$0xff]   ;;  %s1176_s7 = sshll.u32 %s1954_s12, 4  ;;  %s1177_s7 = int_to_ptr.vmem [resolvable:$true] %s1176_s7 }
  0xef   :  { %1360 = vmatprep.mubr.msk.bf16.mxu1 %vm1953_vm1, %v1952_v15  ;;  %1345 = vmatpush3.bf16.msra.mxu1 %v1507_v17  ;;  %v1198_v32 = vld [vmem:[#allocation5] ss:$0 sm:$0xff]  ;;  %v1199_v36 = vld [vmem:[#allocation7] ss:$0 sm:$0xff]  ;;  %v1514_v41 = vld [vmem:[#allocation10 + $0x38] sm:$0xff]   ;;  %s1873_s29 = scalar_lea.vmem %s1177_s7, 128  ;;  %p1878_p7 = scmp.lt.s32.totalorder %s1177_s7, %s1177_s7 }
  0xf0   :  { %1346 = vmatprep.subr.bf16.mxu1 %v1952_v15  ;;  %v1515_v42 = vld [vmem:[#allocation14] sm:$0xff]   ;;  %v1516_v43 = vld [vmem:[#allocation14 + $0x8] sm:$0xff]   ;;  %v1517_v44 = vld [vmem:[#allocation14 + $0x10] sm:$0xff]   ;;  %p1874_p6 = scmp.ne.s32.totalorder %s1177_s7, %s1873_s29  ;;  %p1879_p8 = scmp.lt.s32.totalorder %s1873_s29, %s1873_s29 }
  0xf1   :  { %224 = vadd.xlane.f32.xlu0 %v223_v3  ;;  %1339 = vmatpush3.bf16.msra.mxu0 %v1506_v16  ;;  %v1518_v52 = vld [vmem:[#allocation14 + $0x18] sm:$0xff]   ;;  %v1519_v53 = vld [vmem:[#allocation14 + $0x20] sm:$0xff]   ;;  %v1520_v54 = vld [vmem:[#allocation14 + $0x28] sm:$0xff]  }
  0xf2   :  { %1364 = vmatprep.subr.bf16.mxu0 %v1952_v15  ;;  %v1521_v55 = vld [vmem:[#allocation14 + $0x30] sm:$0xff]   ;;  %v1522_v56 = vld [vmem:[#allocation14 + $0x38] sm:$0xff]   ;;  %v1523_v57 = vld [vmem:[#allocation11] sm:$0xff]   ;;  %p1880_p9 = por %p1879_p8, %p1878_p7 }
  0xf3   :  { %1347 = vmatpush3.bf16.msra.mxu1 %v1508_v18  ;;  %v1524_v58 = vld [vmem:[#allocation11 + $0x8] sm:$0xff]   ;;  %v1525_v59 = vld [vmem:[#allocation11 + $0x10] sm:$0xff]   ;;  %v1526_v60 = vld [vmem:[#allocation11 + $0x18] sm:$0xff]  }
  0xf4   :  { %1348 = vmatprep.subr.bf16.mxu1 %v1952_v15  ;;  %v1527_v61 = vld [vmem:[#allocation11 + $0x20] sm:$0xff]   ;;  %v1528_v62 = vld [vmem:[#allocation11 + $0x28] sm:$0xff]   ;;  %v1529_v63 = vld [vmem:[#allocation11 + $0x30] sm:$0xff]   ;;  %p1881_p10 = pnand %p1880_p9, %p1874_p6 }
  0xf5   :  { %v1530_v14 = vld [vmem:[#allocation11 + $0x38] sm:$0xff]  }
  0xf7   :  { %1349 = vmatpush3.bf16.msra.mxu1 %v1509_v19 }
  0xf8   :  { %1350 = vmatprep.subr.bf16.mxu1 %v1952_v15 }
  0xfb   :  { %1351 = vmatpush3.bf16.msra.mxu1 %v1510_v20 }
  0xfc   :  { %1352 = vmatprep.subr.bf16.mxu1 %v1952_v15 }
  0xff   :  { %1353 = vmatpush3.bf16.msra.mxu1 %v1511_v21  ;;  %v666_v21 = vlaneseq }
 0x100   :  { %1354 = vmatprep.subr.bf16.mxu1 %v1952_v15 }
 0x103   :  { %1355 = vmatpush3.bf16.msra.mxu1 %v1512_v22  ;;  %v667_v22 = vand.u32 127, %v666_v21 }
 0x104   :  { %1356 = vmatprep.subr.bf16.mxu1 %v1952_v15 }
 0x105   :  { %vm668_vm2 = vcmp.lt.s32.totalorder %v667_v22, 12 }
 0x107   :  { %1357 = vmatpush3.bf16.msra.mxu1 %v1513_v23 }
 0x108   :  { %1358 = vmatprep.subr.bf16.mxu1 %v1952_v15 }
 0x10b   :  { %1359 = vmatpush3.bf16.msra.mxu1 %v1514_v41  ;;  %v1535_v41 = vld [vmem:[#allocation13 + $0x20] sm:$0xff]  }
 0x10c   :  { %1384 = vmatprep.subr.bf16.mxu1 %v1952_v15 }
 0x17a   :  { %v222_v4 = vpop.xlane.xlu0 %221 }
 0x17b   :  { %v227_v5 = vmul.f32 0.03125, %v222_v4 }
 0x17d   :  { %v229_v6 = vsub.f32 %v217_v0, %v227_v5 }
 0x17e   :  { %v225_v7 = vpop.xlane.xlu0 %224 }
 0x17f   :  { %v228_v8 = vmul.f32 0.03125, %v225_v7  ;;  %v231_v9 = vmul.f32 %v229_v6, %v229_v6 }
 0x181   :  { %v230_v10 = vsub.f32 %v218_v1, %v228_v8  ;;  %v233_v11 = vsel %vm219_vm0, %v231_v9, 0.0 }
 0x182   :  { %234 = vadd.xlane.f32.xlu1 %v233_v11 }
 0x183   :  { %v232_v12 = vmul.f32 %v230_v10, %v230_v10 }
 0x185   :  { %v236_v13 = vsel %vm219_vm0, %v232_v12, 0.0 }
 0x186   :  { %237 = vadd.xlane.f32.xlu1 %v236_v13 }
 0x20f   :  { %v235_v24 = vpop.xlane.xlu1 %234 }
 0x210   :  { %v239_v25 = vmul.f32 0.03125, %v235_v24 }
 0x212   :  { %v241_v26 = vadd.f32 1e-05, %v239_v25 }
 0x213   :  { %v238_v27 = vpop.xlane.xlu1 %237 }
 0x214   :  { %1563 = vrsqrt.f32 %v241_v26  ;;  %v240_v28 = vmul.f32 0.03125, %v238_v27 }
 0x216   :  { %v242_v29 = vadd.f32 1e-05, %v240_v28 }
 0x218   :  { %1565 = vrsqrt.f32 %v242_v29  ;;  %v1531_v29 = vld [vmem:[#allocation13] sm:$0xff]  }
 0x21e   :  { %v1564_v30 = vpop.eup %1563 }
 0x21f   :  { %v245_v31 = vmul.f32 %v1564_v30, %v229_v6  ;;  %v1532_v30 = vld [vmem:[#allocation13 + $0x8] sm:$0xff]  }
 0x221   :  { %v254_v35 = vmul.f32 %v1198_v32, %v245_v31  ;;  %v1533_v31 = vld [vmem:[#allocation13 + $0x10] sm:$0xff]  }
 0x222   :  { %v1566_v33 = vpop.eup %1565 }
 0x223   :  { %v246_v34 = vmul.f32 %v1566_v33, %v230_v10  ;;  %v263_v38 = vadd.f32 %v1199_v36, %v254_v35 }
 0x225   :  { %v255_v37 = vmul.f32 %v1198_v32, %v246_v34  ;;  %v1534_v32 = vld [vmem:[#allocation13 + $0x18] sm:$0xff]  }
 0x227   :  { %v264_v39 = vadd.f32 %v1199_v36, %v255_v37 }
 0x229   :  { %v265_v40 = vpack.c.bf16 %v264_v39, %v263_v38 }
 0x22b   :  { %1341 = vmatmul.mubr.msk.bf16.vlgmr.msra.gmra.mrb[0].mxu0 %vm219_vm0, %v265_v40 }
 0x22c   :  { %1380 = vmatprep.mubr.msk.bf16.mxu0 %vm1953_vm1, %v1952_v15  ;;  %1365 = vmatpush3.bf16.msra.mxu0 %v1515_v42  ;;  %v1536_v42 = vld [vmem:[#allocation13 + $0x28] sm:$0xff]  }
 0x22d   :  { %1366 = vmatprep.subr.bf16.mxu0 %v1952_v15 }
 0x230   :  { %1367 = vmatpush3.bf16.msra.mxu0 %v1516_v43  ;;  %v1537_v43 = vld [vmem:[#allocation13 + $0x30] sm:$0xff]  }
 0x231   :  { %1368 = vmatprep.subr.bf16.mxu0 %v1952_v15 }
 0x234   :  { %1369 = vmatpush3.bf16.msra.mxu0 %v1517_v44  ;;  %v1538_v44 = vld [vmem:[#allocation13 + $0x38] sm:$0xff]  }
 0x235   :  { %1370 = vmatprep.subr.bf16.mxu0 %v1952_v15 }
 0x238   :  { %1371 = vmatpush3.bf16.msra.mxu0 %v1518_v52 }
 0x239   :  { %1372 = vmatprep.subr.bf16.mxu0 %v1952_v15 }
 0x23c   :  { %1373 = vmatpush3.bf16.msra.mxu0 %v1519_v53 }
 0x23d   :  { %1374 = vmatprep.subr.bf16.mxu0 %v1952_v15 }
 0x240   :  { %1375 = vmatpush3.bf16.msra.mxu0 %v1520_v54 }
 0x241   :  { %1376 = vmatprep.subr.bf16.mxu0 %v1952_v15 }
 0x244   :  { %1377 = vmatpush3.bf16.msra.mxu0 %v1521_v55 }
 0x245   :  { %1378 = vmatprep.subr.bf16.mxu0 %v1952_v15 }
 0x248   :  { %1379 = vmatpush3.bf16.msra.mxu0 %v1522_v56 }
 0x249   :  { %1404 = vmatprep.subr.bf16.mxu0 %v1952_v15 }
 0x2fe   :  { %v319_v45 = vpop.f32.mrb[0].mxu0 }
 0x2ff   :  { %v1342_v46 = vpop.f32.mrb[1].mxu0  ;;  %v442_v47 = vmul.f32 %v319_v45, %v319_v45 }
 0x300   :  { %v322_v48 = vpop.f32.mrb[2].mxu0  ;;  %v1540_v46 = vld [vmem:[#allocation16 + $0x8] sm:$0xff]  }
 0x301   :  { %v326_v49 = vpack.c.bf16 %v322_v48, %v319_v45  ;;  %444 = vadd.xlane.f32.xlu0 %v442_v47  ;;  %v1343_v50 = vpop.f32.mrb[3].mxu0  ;;  %v443_v51 = vmul.f32 %v322_v48, %v322_v48  ;;  %v1541_v47 = vld [vmem:[#allocation16 + $0x10] sm:$0xff]  }
 0x302   :  { %v1544_v50 = vld [vmem:[#allocation16 + $0x28] sm:$0xff]  }
 0x303   :  { %446 = vadd.xlane.f32.xlu1 %v443_v51  ;;  %1361 = vmatmul.mubr.bf16.vlgmr.msra.gmra.mrb[0].mxu1 %v326_v49  ;;  %v1543_v49 = vld [vmem:[#allocation16 + $0x20] sm:$0xff]   ;;  %v1545_v51 = vld [vmem:[#allocation16 + $0x30] sm:$0xff]  }
 0x304   :  { %1400 = vmatprep.mubr.msk.bf16.mxu1 %vm1953_vm1, %v1952_v15  ;;  %1385 = vmatpush3.bf16.msra.mxu1 %v1523_v57 }
 0x305   :  { %1386 = vmatprep.subr.bf16.mxu1 %v1952_v15 }
 0x308   :  { %1387 = vmatpush3.bf16.msra.mxu1 %v1524_v58 }
 0x309   :  { %1388 = vmatprep.subr.bf16.mxu1 %v1952_v15 }
 0x30c   :  { %1389 = vmatpush3.bf16.msra.mxu1 %v1525_v59  ;;  %v1546_v59 = vld [vmem:[#allocation16 + $0x38] sm:$0xff]  }
 0x30d   :  { %1390 = vmatprep.subr.bf16.mxu1 %v1952_v15 }
 0x310   :  { %1391 = vmatpush3.bf16.msra.mxu1 %v1526_v60 }
 0x311   :  { %1392 = vmatprep.subr.bf16.mxu1 %v1952_v15 }
 0x314   :  { %1393 = vmatpush3.bf16.msra.mxu1 %v1527_v61 }
 0x315   :  { %1394 = vmatprep.subr.bf16.mxu1 %v1952_v15 }
 0x318   :  { %1395 = vmatpush3.bf16.msra.mxu1 %v1528_v62 }
 0x319   :  { %1396 = vmatprep.subr.bf16.mxu1 %v1952_v15 }
 0x31c   :  { %1397 = vmatpush3.bf16.msra.mxu1 %v1529_v63 }
 0x31d   :  { %1398 = vmatprep.subr.bf16.mxu1 %v1952_v15 }
 0x320   :  { %1399 = vmatpush3.bf16.msra.mxu1 %v1530_v14  ;;  %v1549_v14 = vld [vmem:[#allocation19 + $0x10] sm:$0xff]  }
 0x321   :  { %1424 = vmatprep.subr.bf16.mxu1 %v1952_v15 }
 0x38e   :  { %v445_v0 = vpop.xlane.xlu0 %444 }
 0x38f   :  { %v448_v1 = vmax.f32 %v445_v0, 1e-24 }
 0x390   :  { %v447_v2 = vpop.xlane.xlu1 %446 }
 0x391   :  { %1567 = vrsqrt.f32 %v448_v1  ;;  %v449_v3 = vmax.f32 %v447_v2, 1e-24  ;;  %v1547_v1 = vld [vmem:[#allocation19] sm:$0xff]   ;;  %v1548_v2 = vld [vmem:[#allocation19 + $0x8] sm:$0xff]  }
 0x393   :  { %1569 = vrsqrt.f32 %v449_v3  ;;  %v1237_v3 = vld [vmem:[#allocation17] ss:$0 sm:$0xff] }
 0x39b   :  { %v1568_v4 = vpop.eup %1567 }
 0x39c   :  { %v2268_v6 = vmul.f32 %v1568_v4, %v319_v45  ;;  %v1539_v45 = vld [vmem:[#allocation16] sm:$0xff]  }
 0x39d   :  { %v1570_v5 = vpop.eup %1569 }
 0x39e   :  { %v2270_v7 = vmul.f32 %v1570_v5, %v322_v48  ;;  %v1542_v48 = vld [vmem:[#allocation16 + $0x18] sm:$0xff]  }
 0x3a0   :  { %v454_v8 = vpack.c.bf16 %v2270_v7, %v2268_v6 }
 0x3a2   :  { %1381 = vmatmul.mubr.bf16.vlgmr.msra.gmra.mrb[4].mxu0 %v454_v8 }
 0x3a3   :  { %1420 = vmatprep.mubr.msk.bf16.mxu0 %vm1953_vm1, %v1952_v15  ;;  %1405 = vmatpush3.bf16.msra.mxu0 %v1531_v29 }
 0x3a4   :  { %1406 = vmatprep.subr.bf16.mxu0 %v1952_v15 }
 0x3a7   :  { %1407 = vmatpush3.bf16.msra.mxu0 %v1532_v30  ;;  %v920_v30 = vmul.f32 0.9, %v2268_v6  ;;  %v1246_v6 = vld [vmem:[#allocation20] ss:$0 sm:$0xff] }
 0x3a8   :  { %1408 = vmatprep.subr.bf16.mxu0 %v1952_v15 }
 0x3ab   :  { %1409 = vmatpush3.bf16.msra.mxu0 %v1533_v31  ;;  %v921_v31 = vmul.f32 0.9, %v2270_v7 }
 0x3ac   :  { %1410 = vmatprep.subr.bf16.mxu0 %v1952_v15 }
 0x3af   :  { %1411 = vmatpush3.bf16.msra.mxu0 %v1534_v32 }
 0x3b0   :  { %1412 = vmatprep.subr.bf16.mxu0 %v1952_v15 }
 0x3b3   :  { %1413 = vmatpush3.bf16.msra.mxu0 %v1535_v41 }
 0x3b4   :  { %1414 = vmatprep.subr.bf16.mxu0 %v1952_v15 }
 0x3b7   :  { %1415 = vmatpush3.bf16.msra.mxu0 %v1536_v42 }
 0x3b8   :  { %1416 = vmatprep.subr.bf16.mxu0 %v1952_v15 }
 0x3bb   :  { %1417 = vmatpush3.bf16.msra.mxu0 %v1537_v43 }
 0x3bc   :  { %1418 = vmatprep.subr.bf16.mxu0 %v1952_v15 }
 0x3bf   :  { %1419 = vmatpush3.bf16.msra.mxu0 %v1538_v44 }
 0x3c0   :  { %1444 = vmatprep.subr.bf16.mxu0 %v1952_v15 }
 0x3d6   :  { %v425_v9 = vpop.f32.mrb[0].mxu1 }
 0x3d7   :  { %v1362_v10 = vpop.f32.mrb[1].mxu1 }
 0x3d8   :  { %v428_v11 = vpop.f32.mrb[2].mxu1 }
 0x3d9   :  { %v1268_v12 = vpack.c.bf16 %v428_v11, %v425_v9  ;;  %v1363_v13 = vpop.f32.mrb[3].mxu1 }
 0x3db   :  { %1269 = vst [vmem:[#allocation24] sm:$0xff] %v1268_v12  }
 0x475   :  { %v553_v16 = vpop.f32.mrb[4].mxu0 }
 0x476   :  { %v1382_v17 = vpop.f32.mrb[5].mxu0 }
 0x477   :  { %v556_v18 = vpop.f32.mrb[6].mxu0  ;;  %v1551_v17 = vld [vmem:[#allocation19 + $0x20] sm:$0xff]  }
 0x478   :  { %v560_v19 = vpack.c.bf16 %v556_v18, %v553_v16  ;;  %v1383_v20 = vpop.f32.mrb[7].mxu0  ;;  %v1550_v16 = vld [vmem:[#allocation19 + $0x18] sm:$0xff]   ;;  %v1552_v18 = vld [vmem:[#allocation19 + $0x28] sm:$0xff]  }
 0x479   :  { %v1554_v20 = vld [vmem:[#allocation19 + $0x38] sm:$0xff]  }
 0x47a   :  { %1401 = vmatmul.mubr.bf16.vlgmr.msra.gmra.mrb[4].mxu1 %v560_v19  ;;  %v1553_v19 = vld [vmem:[#allocation19 + $0x30] sm:$0xff]  }
 0x47b   :  { %1440 = vmatprep.mubr.msk.bf16.mxu1 %vm1953_vm1, %v1952_v15  ;;  %1425 = vmatpush3.bf16.msra.mxu1 %v1539_v45 }
 0x47c   :  { %1426 = vmatprep.subr.bf16.mxu1 %v1952_v15 }
 0x47f   :  { %1427 = vmatpush3.bf16.msra.mxu1 %v1540_v46  ;;  %v1558_v46 = vld [vmem:[#allocation22 + $0x18] sm:$0xff]  }
 0x480   :  { %1428 = vmatprep.subr.bf16.mxu1 %v1952_v15 }
 0x483   :  { %1429 = vmatpush3.bf16.msra.mxu1 %v1541_v47  ;;  %v1559_v47 = vld [vmem:[#allocation22 + $0x20] sm:$0xff]  }
 0x484   :  { %1430 = vmatprep.subr.bf16.mxu1 %v1952_v15 }
 0x487   :  { %1431 = vmatpush3.bf16.msra.mxu1 %v1542_v48  ;;  %v1560_v48 = vld [vmem:[#allocation22 + $0x28] sm:$0xff]  }
 0x488   :  { %1432 = vmatprep.subr.bf16.mxu1 %v1952_v15 }
 0x48b   :  { %1433 = vmatpush3.bf16.msra.mxu1 %v1543_v49  ;;  %v1561_v49 = vld [vmem:[#allocation22 + $0x30] sm:$0xff]  }
 0x48c   :  { %1434 = vmatprep.subr.bf16.mxu1 %v1952_v15 }
 0x48f   :  { %1435 = vmatpush3.bf16.msra.mxu1 %v1544_v50  ;;  %v1562_v50 = vld [vmem:[#allocation22 + $0x38] sm:$0xff]  }
 0x490   :  { %1436 = vmatprep.subr.bf16.mxu1 %v1952_v15 }
 0x493   :  { %1437 = vmatpush3.bf16.msra.mxu1 %v1545_v51 }
 0x494   :  { %1438 = vmatprep.subr.bf16.mxu1 %v1952_v15 }
 0x497   :  { %1439 = vmatpush3.bf16.msra.mxu1 %v1546_v59 }
 0x498   :  { %1464 = vmatprep.subr.bf16.mxu1 %v1952_v15 }
 0x54d   :  { %v659_v23 = vpop.f32.mrb[4].mxu1 }
 0x54e   :  { %v1402_v24 = vpop.f32.mrb[5].mxu1  ;;  %v669_v25 = vsel %vm668_vm2, %v659_v23, -1e+30 }
 0x54f   :  { %671 = vmax.xlane.f32.xlu0 %v669_v25  ;;  %v662_v26 = vpop.f32.mrb[6].mxu1 }
 0x550   :  { %v1403_v27 = vpop.f32.mrb[7].mxu1  ;;  %v670_v28 = vsel %vm668_vm2, %v662_v26, -1e+30 }
 0x551   :  { %673 = vmax.xlane.f32.xlu1 %v670_v28 }
 0x5dc   :  { %v672_v33 = vpop.xlane.xlu0 %671 }
 0x5dd   :  { %v675_v34 = vsub.f32 %v669_v25, %v672_v33 }
 0x5de   :  { %v674_v35 = vpop.xlane.xlu1 %673 }
 0x5df   :  { %v677_v36 = vmul.f32 1.442695, %v675_v34  ;;  %v676_v37 = vsub.f32 %v670_v28, %v674_v35 }
 0x5e1   :  { %1571 = vpow2.f32 %v677_v36  ;;  %v679_v38 = vmul.f32 1.442695, %v676_v37  ;;  %v1555_v36 = vld [vmem:[#allocation22] sm:$0xff]   ;;  %v1556_v37 = vld [vmem:[#allocation22 + $0x8] sm:$0xff]  }
 0x5e3   :  { %1573 = vpow2.f32 %v679_v38  ;;  %v1557_v38 = vld [vmem:[#allocation22 + $0x10] sm:$0xff]  }
 0x5eb   :  { %v1572_v39 = vpop.eup %1571 }
 0x5ec   :  { %681 = vadd.xlane.f32.xlu0 %v1572_v39 }
 0x5ed   :  { %v1574_v40 = vpop.eup %1573 }
 0x5ee   :  { %683 = vadd.xlane.f32.xlu1 %v1574_v40 }
 0x679   :  { %v682_v52 = vpop.xlane.xlu0 %681 }
 0x67a   :  { %1575 = vrcp.f32 %v682_v52 }
 0x67b   :  { %v684_v53 = vpop.xlane.xlu1 %683 }
 0x67c   :  { %1577 = vrcp.f32 %v684_v53 }
 0x684   :  { %v1576_v54 = vpop.eup %1575 }
 0x685   :  { %v687_v56 = vmul.f32 %v1576_v54, %v1572_v39 }
 0x686   :  { %v1578_v55 = vpop.eup %1577 }
 0x687   :  { %v688_v57 = vmul.f32 %v1578_v55, %v1574_v40 }
 0x689   :  { %v689_v58 = vpack.c.bf16 %v688_v57, %v687_v56 }
 0x68b   :  { %1421 = vmatmul.mubr.bf16.vlgmr.msra.gmra.mrb[8].mxu0 %v689_v58 }
 0x68c   :  { %1460 = vmatprep.mubr.msk.bf16.mxu0 %vm1953_vm1, %v1952_v15  ;;  %1445 = vmatpush3.bf16.msra.mxu0 %v1547_v1 }
 0x68d   :  { %1446 = vmatprep.subr.bf16.mxu0 %v1952_v15 }
 0x690   :  { %1447 = vmatpush3.bf16.msra.mxu0 %v1548_v2 }
 0x691   :  { %1448 = vmatprep.subr.bf16.mxu0 %v1952_v15 }
 0x694   :  { %1449 = vmatpush3.bf16.msra.mxu0 %v1549_v14 }
 0x695   :  { %1450 = vmatprep.subr.bf16.mxu0 %v1952_v15 }
 0x698   :  { %1451 = vmatpush3.bf16.msra.mxu0 %v1550_v16 }
 0x699   :  { %1452 = vmatprep.subr.bf16.mxu0 %v1952_v15 }
 0x69c   :  { %1453 = vmatpush3.bf16.msra.mxu0 %v1551_v17 }
 0x69d   :  { %1454 = vmatprep.subr.bf16.mxu0 %v1952_v15 }
 0x6a0   :  { %1455 = vmatpush3.bf16.msra.mxu0 %v1552_v18 }
 0x6a1   :  { %1456 = vmatprep.subr.bf16.mxu0 %v1952_v15 }
 0x6a4   :  { %1457 = vmatpush3.bf16.msra.mxu0 %v1553_v19 }
 0x6a5   :  { %1458 = vmatprep.subr.bf16.mxu0 %v1952_v15 }
 0x6a8   :  { %1459 = vmatpush3.bf16.msra.mxu0 %v1554_v20 }
 0x75e   :  { %v788_v60 = vpop.f32.mrb[8].mxu0 }
 0x75f   :  { %v1422_v61 = vpop.f32.mrb[9].mxu0 }
 0x760   :  { %v791_v62 = vpop.f32.mrb[10].mxu0 }
 0x761   :  { %v795_v63 = vpack.c.bf16 %v791_v62, %v788_v60  ;;  %v1423_v0 = vpop.f32.mrb[11].mxu0 }
 0x763   :  { %1441 = vmatmul.mubr.bf16.vlgmr.msra.gmra.mrb[8].mxu1 %v795_v63 }
 0x764   :  { %1480 = vmatprep.mubr.msk.bf16.mxu1 %vm1953_vm1, %v1952_v15  ;;  %1465 = vmatpush3.bf16.msra.mxu1 %v1555_v36 }
 0x765   :  { %1466 = vmatprep.subr.bf16.mxu1 %v1952_v15 }
 0x768   :  { %1467 = vmatpush3.bf16.msra.mxu1 %v1556_v37 }
 0x769   :  { %1468 = vmatprep.subr.bf16.mxu1 %v1952_v15 }
 0x76c   :  { %1469 = vmatpush3.bf16.msra.mxu1 %v1557_v38 }
 0x76d   :  { %1470 = vmatprep.subr.bf16.mxu1 %v1952_v15 }
 0x770   :  { %1471 = vmatpush3.bf16.msra.mxu1 %v1558_v46 }
 0x771   :  { %1472 = vmatprep.subr.bf16.mxu1 %v1952_v15 }
 0x774   :  { %1473 = vmatpush3.bf16.msra.mxu1 %v1559_v47 }
 0x775   :  { %1474 = vmatprep.subr.bf16.mxu1 %v1952_v15 }
 0x778   :  { %1475 = vmatpush3.bf16.msra.mxu1 %v1560_v48 }
 0x779   :  { %1476 = vmatprep.subr.bf16.mxu1 %v1952_v15 }
 0x77c   :  { %1477 = vmatpush3.bf16.msra.mxu1 %v1561_v49 }
 0x77d   :  { %1478 = vmatprep.subr.bf16.mxu1 %v1952_v15 }
 0x780   :  { %1479 = vmatpush3.bf16.msra.mxu1 %v1562_v50 }
 0x836   :  { %v901_v4 = vpop.f32.mrb[8].mxu1 }
 0x837   :  { %v902_v5 = vadd.f32 %v1237_v3, %v901_v4  ;;  %v1442_v8 = vpop.f32.mrb[9].mxu1 }
 0x838   :  { %v904_v9 = vpop.f32.mrb[10].mxu1 }
 0x839   :  { %v905_v10 = vadd.f32 %v1237_v3, %v904_v9  ;;  %v1443_v11 = vpop.f32.mrb[11].mxu1  ;;  %v908_v12 = vmul.f32 %v902_v5, %v902_v5 }
 0x83b   :  { %910 = vadd.xlane.f32.xlu0 %v908_v12  ;;  %v909_v13 = vmul.f32 %v905_v10, %v905_v10 }
 0x83d   :  { %912 = vadd.xlane.f32.xlu1 %v909_v13 }
 0x8c8   :  { %v911_v21 = vpop.xlane.xlu0 %910 }
 0x8c9   :  { %v914_v22 = vmax.f32 %v911_v21, 1e-24 }
 0x8ca   :  { %v913_v23 = vpop.xlane.xlu1 %912 }
 0x8cb   :  { %1579 = vrsqrt.f32 %v914_v22  ;;  %v915_v24 = vmax.f32 %v913_v23, 1e-24 }
 0x8cd   :  { %1581 = vrsqrt.f32 %v915_v24 }
 0x8d5   :  { %v1580_v25 = vpop.eup %1579 }
 0x8d6   :  { %v918_v26 = vmul.f32 %v1580_v25, %v902_v5 }
 0x8d7   :  { %v1582_v27 = vpop.eup %1581 }
 0x8d8   :  { %v919_v28 = vmul.f32 %v1582_v27, %v905_v10  ;;  %v922_v29 = vmul.f32 0.1, %v918_v26 }
 0x8da   :  { %v923_v32 = vmul.f32 0.1, %v919_v28  ;;  %v924_v33 = vadd.f32 %v922_v29, %v920_v30 }
 0x8dc   :  { %v925_v34 = vadd.f32 %v923_v32, %v921_v31 }
 0x8de   :  { %v926_v35 = vpack.c.bf16 %v925_v34, %v924_v33 }
 0x8e0   :  { %1461 = vmatmul.mubr.bf16.vlgmr.msra.gmra.mrb[12].mxu0 %v926_v35 }
 0x9b3   :  { %v1032_v39 = vpop.f32.mrb[12].mxu0 }
 0x9b4   :  { %v1033_v7 = vadd.f32 %v1246_v6, %v1032_v39  ;;  %v1462_v40 = vpop.f32.mrb[13].mxu0 }
 0x9b5   :  { %v1035_v41 = vpop.f32.mrb[14].mxu0 }
 0x9b6   :  { %v1036_v42 = vadd.f32 %v1246_v6, %v1035_v41  ;;  %v1463_v43 = vpop.f32.mrb[15].mxu0  ;;  %v1039_v44 = vmul.f32 %v1033_v7, %v1033_v7 }
 0x9b8   :  { %1041 = vadd.xlane.f32.xlu0 %v1039_v44  ;;  %v1040_v45 = vmul.f32 %v1036_v42, %v1036_v42 }
 0x9ba   :  { %1043 = vadd.xlane.f32.xlu1 %v1040_v45 }
 0xa45   :  { %v1042_v51 = vpop.xlane.xlu0 %1041 }
 0xa46   :  { %v1045_v52 = vmax.f32 %v1042_v51, 1e-24 }
 0xa47   :  { %v1044_v53 = vpop.xlane.xlu1 %1043 }
 0xa48   :  { %1583 = vrsqrt.f32 %v1045_v52  ;;  %v1046_v54 = vmax.f32 %v1044_v53, 1e-24 }
 0xa4a   :  { %1585 = vrsqrt.f32 %v1046_v54 }
 0xa52   :  { %v1584_v55 = vpop.eup %1583 }
 0xa53   :  { %v1049_v57 = vmul.f32 %v1584_v55, %v1033_v7 }
 0xa54   :  { %v1586_v56 = vpop.eup %1585 }
 0xa55   :  { %v1050_v58 = vmul.f32 %v1586_v56, %v1036_v42 }
 0xa57   :  { %v1051_v59 = vpack.c.bf16 %v1050_v58, %v1049_v57 }
 0xa59   :  { %1481 = vmatmul.mubr.bf16.vlgmr.msra.gmra.mrb[12].mxu1 %v1051_v59 }
 0xa5a   :  { %1884 = shalt.err (!%p1881_p10)
}
 0xa5b   :  { %s1885_s15 = scalar_lea.hbm %s2359_s14, 128 }
 0xa5c   :  { %p1886_p11 = scmp.ne.s32.totalorder %s2359_s14, %s1885_s15  ;;  %p1889_p12 = scmp.lt.u32.totalorder %s1885_s15, %s2359_s14 }
 0xa5e   :  { %p1891_p13 = pnand %p1889_p12, %p1886_p11 }
 0xa60   :  { %1894 = shalt.err (!%p1891_p13)
}
 0xa61   :  { %1182 = dma.vmem_to_hbm [thread:$0]  %s1177_s7, 128, %s2359_s14, [#allocation25], %s1937_s1, %s1937_s1, %s1938_s30  }
 0xa62   :  { %s1955_s8 = smov [#allocation23]  }
 0xa63   :  { %s1164_s27 = sshll.u32 %s1955_s8, 4  ;;  %s1165_s27 = int_to_ptr.vmem [resolvable:$true] %s1164_s27 }
 0xa64   :  { %s1895_s20 = scalar_lea.vmem %s1165_s27, 256  ;;  %p1900_p1 = scmp.lt.s32.totalorder %s1165_s27, %s1165_s27 }
 0xa65   :  { %p1896_p0 = scmp.ne.s32.totalorder %s1165_s27, %s1895_s20  ;;  %p1901_p2 = scmp.lt.s32.totalorder %s1895_s20, %s1895_s20 }
 0xa67   :  { %p1902_p3 = por %p1901_p2, %p1900_p1 }
 0xa69   :  { %p1903_p4 = pnand %p1902_p3, %p1896_p0 }
 0xb2c   :  { %v1150_v15 = vpop.f32.mrb[12].mxu1 }
 0xb2d   :  { %1157 = vst [vmem:[#allocation23] sm:$0xff] %v1150_v15  ;;  %v1482_v60 = vpop.f32.mrb[13].mxu1 }
 0xb2e   :  { %v1153_v61 = vpop.f32.mrb[14].mxu1 }
 0xb2f   :  { %1158 = vst [vmem:[#allocation23 + $0x8] sm:$0xff] %v1153_v61  ;;  %v1483_v62 = vpop.f32.mrb[15].mxu1 }
 0xb30   :  { %1906 = shalt.err (!%p1903_p4)
}
 0xb31   :  { %s1907_s14 = scalar_lea.hbm %s2358_s13, 256 }
 0xb32   :  { %p1908_p5 = scmp.ne.s32.totalorder %s2358_s13, %s1907_s14  ;;  %p1911_p6 = scmp.lt.u32.totalorder %s1907_s14, %s2358_s13 }
 0xb34   :  { %p1913_p7 = pnand %p1911_p6, %p1908_p5 }
 0xb36   :  { %1916 = shalt.err (!%p1913_p7)
}
 0xb37   :  { %1170 = dma.vmem_to_hbm [thread:$0]  %s1165_s27, 256, %s2358_s13, [#allocation4], %s1944_s11, %s1944_s11, %s1945_s3  }
 0xb38   :  { %1931 = dma.done.wait [#allocation4], 256  }
 0xb39   :  { %1932 = vsyncadd [#allocation4], 4294967040 }
 0xb3a   :  { %1933 = dma.done.wait [#allocation25], 128  }
 0xb3b   :  { %1934 = vsyncadd [#allocation25], 4294967168 }
 0xb3c   :  { %1189 = vsyncpa [#allocation3], 1 }
 0xb3d   :  { %1190 = vsyncpa [#allocation6], 1 }
 0xb3e   :  { %1191 = vsyncpa [#allocation9], 1 }
 0xb3f   :  { %1192 = vsyncpa [#allocation12], 1 }
 0xb40   :  { %1193 = vsyncpa [#allocation15], 1 }
 0xb41   :  { %1194 = vsyncpa [#allocation18], 1 }
 0xb42   :  { %1195 = vsyncpa [#allocation21], 1 }
 0xb43   :  { %1196 = vsyncpa [#allocation4], 1 }
 0xb44   :  { %1197 = vsyncpa [#allocation25], 1 }

// kernel: tpu_custom_call.1
= control target key start
LH: loop header
LB: loop body
LE: loop exit
PB: predicated region body
PF: predicated region fallthrough
CT: control target
= control target key end

     0   :  { %20 = vsyncpa [#allocation3], 0  ;;  %s2345_s0 = inlined_call_operand.hbm [shape: f32[16,32], index: 0, kind: input, shape index: {}]   ;;  %s2346_s1 = inlined_call_operand.hbm [shape: f32[1,32], index: 1, kind: input, shape index: {}]   ;;  %s2347_s2 = inlined_call_operand.hbm [shape: f32[1,32], index: 2, kind: input, shape index: {}]   ;;  %s2348_s3 = inlined_call_operand.hbm [shape: bf16[32,128], index: 3, kind: input, shape index: {}]   ;;  %s2349_s4 = inlined_call_operand.hbm [shape: bf16[128,128], index: 4, kind: input, shape index: {}]   ;;  %s2350_s5 = inlined_call_operand.hbm [shape: bf16[128,128], index: 5, kind: input, shape index: {}]   ;;  %s2351_s6 = inlined_call_operand.hbm [shape: bf16[128,128], index: 6, kind: input, shape index: {}]   ;;  %s2352_s7 = inlined_call_operand.hbm [shape: bf16[128,128], index: 7, kind: input, shape index: {}]   ;;  %s2353_s8 = inlined_call_operand.hbm [shape: bf16[128,128], index: 8, kind: input, shape index: {}]   ;;  %s2354_s9 = inlined_call_operand.hbm [shape: f32[1,128], index: 9, kind: input, shape index: {}]   ;;  %s2355_s10 = inlined_call_operand.hbm [shape: bf16[128,128], index: 10, kind: input, shape index: {}]   ;;  %s2356_s11 = inlined_call_operand.hbm [shape: f32[1,128], index: 11, kind: input, shape index: {}]   ;;  %s2357_s12 = inlined_call_operand.hbm [shape: bf16[128,128], index: 12, kind: input, shape index: {}]   ;;  %s2358_s13 = inlined_call_operand.hbm [shape: f32[16,128], index: 13, kind: output, shape index: {0}]   ;;  %s2359_s14 = inlined_call_operand.hbm [shape: bf16[16,128], index: 14, kind: output, shape index: {1}]  }
   0x1   :  { %21 = vsyncpa [#allocation6], 0 }
   0x2   :  { %22 = vsyncpa [#allocation9], 0 }
   0x3   :  { %23 = vsyncpa [#allocation12], 0 }
   0x4   :  { %24 = vsyncpa [#allocation15], 0 }
   0x5   :  { %25 = vsyncpa [#allocation18], 0 }
   0x6   :  { %26 = vsyncpa [#allocation21], 0 }
   0x7   :  { %27 = vsyncpa [#allocation4], 0 }
   0x8   :  { %28 = vsyncpa [#allocation25], 0  ;;  %s1935_s29 = smov [#allocation5]   ;;  %s1936_s15 = smov [#allocation8]  }
   0x9   :  { %s47_s30 = sshll.u32 %s1935_s29, 4  ;;  %s66_s16 = sshll.u32 %s1936_s15, 4  ;;  %s48_s30 = int_to_ptr.vmem [resolvable:$true] %s47_s30  ;;  %s2031_s16 = int_to_ptr.vmem [resolvable:$true] %s66_s16 }
   0xa   :  { %s1587_s19 = scalar_lea.hbm %s2346_s1, 16 }
   0xb   :  { %p1588_p0 = scmp.ne.s32.totalorder %s2346_s1, %s1587_s19  ;;  %p1591_p1 = scmp.lt.u32.totalorder %s1587_s19, %s2346_s1 }
   0xd   :  { %p1593_p2 = pnand %p1591_p1, %p1588_p0 }
   0xf   :  { %1596 = shalt.err (!%p1593_p2)
}
  0x10   :  { %s1597_s24 = scalar_lea.vmem %s48_s30, 16  ;;  %s1601_s25 = scalar_lea.vmem %s48_s30, 32 }
  0x11   :  { %p1598_p3 = scmp.ne.s32.totalorder %s48_s30, %s1597_s24  ;;  %p1602_p4 = scmp.lt.s32.totalorder %s48_s30, %s48_s30 }
  0x12   :  { %p1603_p5 = scmp.lt.s32.totalorder %s1601_s25, %s1597_s24 }
  0x14   :  { %p1604_p6 = por %p1603_p5, %p1602_p4 }
  0x16   :  { %p1605_p7 = pnand %p1604_p6, %p1598_p3 }
  0x18   :  { %1608 = shalt.err (!%p1605_p7)
}
  0x19   :  { %50 = dma.hbm_to_vmem [thread:$0]  %s2346_s1, 16, %s48_s30, [#allocation6]  }
  0x1a   :  { %s1609_s15 = scalar_lea.hbm %s2348_s3, 256 }
  0x1b   :  { %p1610_p8 = scmp.ne.s32.totalorder %s2348_s3, %s1609_s15  ;;  %p1613_p9 = scmp.lt.u32.totalorder %s1609_s15, %s2348_s3 }
  0x1d   :  { %p1615_p10 = pnand %p1613_p9, %p1610_p8 }
  0x1f   :  { %1618 = shalt.err (!%p1615_p10)
}
  0x20   :  { %s1619_s21 = scalar_lea.vmem %s2031_s16, 256  ;;  %p1624_p12 = scmp.lt.s32.totalorder %s2031_s16, %s2031_s16 }
  0x21   :  { %p1620_p11 = scmp.ne.s32.totalorder %s2031_s16, %s1619_s21  ;;  %p1625_p13 = scmp.lt.s32.totalorder %s1619_s21, %s1619_s21 }
  0x23   :  { %p1626_p0 = por %p1625_p13, %p1624_p12 }
  0x25   :  { %p1627_p1 = pnand %p1626_p0, %p1620_p11 }
  0x27   :  { %1630 = shalt.err (!%p1627_p1)
}
  0x28   :  { %s1937_s1 = smov 64   ;;  %s1938_s30 = smov 4  }
  0x29   :  { %72 = dma.hbm_to_vmem [thread:$0]  %s2348_s3, 256, %s2031_s16, [#allocation9], %s1937_s1, %s1937_s1, %s1938_s30  }
  0x2a   :  { %s1939_s24 = smov [#allocation11]   ;;  %s1940_s26 = smov [#allocation14]  }
  0x2b   :  { %s90_s25 = sshll.u32 %s1939_s24, 4  ;;  %s114_s27 = sshll.u32 %s1940_s26, 4  ;;  %s91_s25 = int_to_ptr.vmem [resolvable:$true] %s90_s25  ;;  %s2065_s27 = int_to_ptr.vmem [resolvable:$true] %s114_s27 }
  0x2c   :  { %s1631_s15 = scalar_lea.hbm %s2350_s5, 1024 }
  0x2d   :  { %p1632_p2 = scmp.ne.s32.totalorder %s2350_s5, %s1631_s15  ;;  %p1635_p3 = scmp.lt.u32.totalorder %s1631_s15, %s2350_s5 }
  0x2f   :  { %p1637_p4 = pnand %p1635_p3, %p1632_p2 }
  0x31   :  { %1640 = shalt.err (!%p1637_p4)
}
  0x32   :  { %s1641_s3 = scalar_lea.vmem %s91_s25, 1024  ;;  %p1646_p6 = scmp.lt.s32.totalorder %s91_s25, %s91_s25 }
  0x33   :  { %p1642_p5 = scmp.ne.s32.totalorder %s91_s25, %s1641_s3  ;;  %p1647_p7 = scmp.lt.s32.totalorder %s1641_s3, %s1641_s3 }
  0x35   :  { %p1648_p8 = por %p1647_p7, %p1646_p6 }
  0x37   :  { %p1649_p9 = pnand %p1648_p8, %p1642_p5 }
  0x39   :  { %1652 = shalt.err (!%p1649_p9)
}
  0x3a   :  { %96 = dma.hbm_to_vmem [thread:$0]  %s2350_s5, 1024, %s91_s25, [#allocation12], %s1937_s1, %s1937_s1, %s1938_s30  }
  0x3b   :  { %s1653_s24 = scalar_lea.hbm %s2352_s7, 1024 }
  0x3c   :  { %p1654_p10 = scmp.ne.s32.totalorder %s2352_s7, %s1653_s24  ;;  %p1657_p11 = scmp.lt.u32.totalorder %s1653_s24, %s2352_s7 }
  0x3e   :  { %p1659_p12 = pnand %p1657_p11, %p1654_p10 }
  0x40   :  { %1662 = shalt.err (!%p1659_p12)
}
  0x41   :  { %s1663_s17 = scalar_lea.vmem %s2065_s27, 1024  ;;  %p1668_p0 = scmp.lt.s32.totalorder %s2065_s27, %s2065_s27 }
  0x42   :  { %p1664_p13 = scmp.ne.s32.totalorder %s2065_s27, %s1663_s17  ;;  %p1669_p1 = scmp.lt.s32.totalorder %s1663_s17, %s1663_s17 }
  0x44   :  { %p1670_p2 = por %p1669_p1, %p1668_p0 }
  0x46   :  { %p1671_p3 = pnand %p1670_p2, %p1664_p13 }
  0x48   :  { %1674 = shalt.err (!%p1671_p3)
}
  0x49   :  { %120 = dma.hbm_to_vmem [thread:$0]  %s2352_s7, 1024, %s2065_s27, [#allocation15], %s1937_s1, %s1937_s1, %s1938_s30  }
  0x4a   :  { %s1941_s18 = smov [#allocation17]   ;;  %s1942_s20 = smov [#allocation20]  }
  0x4b   :  { %s139_s19 = sshll.u32 %s1941_s18, 4  ;;  %s161_s3 = sshll.u32 %s1942_s20, 4  ;;  %s140_s19 = int_to_ptr.vmem [resolvable:$true] %s139_s19  ;;  %s162_s3 = int_to_ptr.vmem [resolvable:$true] %s161_s3 }
  0x4c   :  { %s1675_s22 = scalar_lea.hbm %s2354_s9, 16 }
  0x4d   :  { %p1676_p4 = scmp.ne.s32.totalorder %s2354_s9, %s1675_s22  ;;  %p1679_p5 = scmp.lt.u32.totalorder %s1675_s22, %s2354_s9 }
  0x4f   :  { %p1681_p6 = pnand %p1679_p5, %p1676_p4 }
  0x51   :  { %1684 = shalt.err (!%p1681_p6)
}
  0x52   :  { %s1685_s7 = scalar_lea.vmem %s140_s19, 16  ;;  %s1689_s27 = scalar_lea.vmem %s140_s19, 32 }
  0x53   :  { %p1686_p7 = scmp.ne.s32.totalorder %s140_s19, %s1685_s7  ;;  %p1690_p8 = scmp.lt.s32.totalorder %s140_s19, %s140_s19 }
  0x54   :  { %p1691_p9 = scmp.lt.s32.totalorder %s1689_s27, %s1685_s7 }
  0x56   :  { %p1692_p10 = por %p1691_p9, %p1690_p8 }
  0x58   :  { %p1693_p11 = pnand %p1692_p10, %p1686_p7 }
  0x5a   :  { %1696 = shalt.err (!%p1693_p11)
}
  0x5b   :  { %142 = dma.hbm_to_vmem [thread:$0]  %s2354_s9, 16, %s140_s19, [#allocation18]  }
  0x5c   :  { %s1697_s25 = scalar_lea.hbm %s2356_s11, 16 }
  0x5d   :  { %p1698_p12 = scmp.ne.s32.totalorder %s2356_s11, %s1697_s25  ;;  %p1701_p13 = scmp.lt.u32.totalorder %s1697_s25, %s2356_s11 }
  0x5f   :  { %p1703_p0 = pnand %p1701_p13, %p1698_p12 }
  0x61   :  { %1706 = shalt.err (!%p1703_p0)
}
  0x62   :  { %s1707_s22 = scalar_lea.vmem %s162_s3, 16  ;;  %s1711_s23 = scalar_lea.vmem %s162_s3, 32 }
  0x63   :  { %p1708_p1 = scmp.ne.s32.totalorder %s162_s3, %s1707_s22  ;;  %p1712_p2 = scmp.lt.s32.totalorder %s162_s3, %s162_s3 }
  0x64   :  { %p1713_p3 = scmp.lt.s32.totalorder %s1711_s23, %s1707_s22 }
  0x66   :  { %p1714_p4 = por %p1713_p3, %p1712_p2 }
  0x68   :  { %p1715_p5 = pnand %p1714_p4, %p1708_p1 }
  0x6a   :  { %1718 = shalt.err (!%p1715_p5)
}
  0x6b   :  { %164 = dma.hbm_to_vmem [thread:$0]  %s2356_s11, 16, %s162_s3, [#allocation21]  }
  0x6c   :  { %s1943_s24 = smov [#allocation2]   ;;  %s1719_s27 = scalar_lea.hbm %s2345_s0, 256 }
  0x6d   :  { %s34_s26 = sshll.u32 %s1943_s24, 4  ;;  %p1720_p6 = scmp.ne.s32.totalorder %s2345_s0, %s1719_s27  ;;  %s35_s26 = int_to_ptr.vmem [resolvable:$true] %s34_s26 }
  0x6e   :  { %p1723_p7 = scmp.lt.u32.totalorder %s1719_s27, %s2345_s0 }
  0x70   :  { %p1725_p8 = pnand %p1723_p7, %p1720_p6 }
  0x72   :  { %1728 = shalt.err (!%p1725_p8)
}
  0x73   :  { %s1729_s25 = scalar_lea.vmem %s35_s26, 256  ;;  %p1734_p10 = scmp.lt.s32.totalorder %s35_s26, %s35_s26 }
  0x74   :  { %p1730_p9 = scmp.ne.s32.totalorder %s35_s26, %s1729_s25  ;;  %p1735_p11 = scmp.lt.s32.totalorder %s1729_s25, %s1729_s25 }
  0x76   :  { %p1736_p12 = por %p1735_p11, %p1734_p10 }
  0x78   :  { %p1737_p13 = pnand %p1736_p12, %p1730_p9 }
  0x7a   :  { %1740 = shalt.err (!%p1737_p13)
}
  0x7b   :  { %s1944_s11 = smov 128   ;;  %s1945_s3 = smov 8  }
  0x7c   :  { %40 = dma.hbm_to_vmem [thread:$0]  %s2345_s0, 256, %s35_s26, [#allocation3], %s1944_s11, %s1944_s11, %s1945_s3  }
  0x7d   :  { %s1946_s16 = smov [#allocation7]   ;;  %s1947_s22 = smov [#allocation10]  }
  0x7e   :  { %s57_s21 = sshll.u32 %s1946_s16, 4  ;;  %s78_s23 = sshll.u32 %s1947_s22, 4  ;;  %s58_s21 = int_to_ptr.vmem [resolvable:$true] %s57_s21  ;;  %s79_s23 = int_to_ptr.vmem [resolvable:$true] %s78_s23 }
  0x7f   :  { %s1741_s24 = scalar_lea.hbm %s2347_s2, 16 }
  0x80   :  { %p1742_p0 = scmp.ne.s32.totalorder %s2347_s2, %s1741_s24  ;;  %p1745_p1 = scmp.lt.u32.totalorder %s1741_s24, %s2347_s2 }
  0x82   :  { %p1747_p2 = pnand %p1745_p1, %p1742_p0 }
  0x84   :  { %1750 = shalt.err (!%p1747_p2)
}
  0x85   :  { %s1751_s0 = scalar_lea.vmem %s58_s21, 16  ;;  %s1755_s26 = scalar_lea.vmem %s58_s21, 32 }
  0x86   :  { %p1752_p3 = scmp.ne.s32.totalorder %s58_s21, %s1751_s0  ;;  %p1756_p4 = scmp.lt.s32.totalorder %s58_s21, %s58_s21 }
  0x87   :  { %p1757_p5 = scmp.lt.s32.totalorder %s1755_s26, %s1751_s0 }
  0x89   :  { %p1758_p6 = por %p1757_p5, %p1756_p4 }
  0x8b   :  { %p1759_p7 = pnand %p1758_p6, %p1752_p3 }
  0x8d   :  { %1762 = shalt.err (!%p1759_p7)
}
  0x8e   :  { %60 = dma.hbm_to_vmem [thread:$0]  %s2347_s2, 16, %s58_s21, [#allocation6]  }
  0x8f   :  { %s1763_s18 = scalar_lea.hbm %s2349_s4, 1024 }
  0x90   :  { %p1764_p8 = scmp.ne.s32.totalorder %s2349_s4, %s1763_s18  ;;  %p1767_p9 = scmp.lt.u32.totalorder %s1763_s18, %s2349_s4 }
  0x92   :  { %p1769_p10 = pnand %p1767_p9, %p1764_p8 }
  0x94   :  { %1772 = shalt.err (!%p1769_p10)
}
  0x95   :  { %s1773_s19 = scalar_lea.vmem %s79_s23, 1024  ;;  %p1778_p12 = scmp.lt.s32.totalorder %s79_s23, %s79_s23 }
  0x96   :  { %p1774_p11 = scmp.ne.s32.totalorder %s79_s23, %s1773_s19  ;;  %p1779_p13 = scmp.lt.s32.totalorder %s1773_s19, %s1773_s19 }
  0x98   :  { %p1780_p0 = por %p1779_p13, %p1778_p12 }
  0x9a   :  { %p1781_p1 = pnand %p1780_p0, %p1774_p11 }
  0x9c   :  { %1784 = shalt.err (!%p1781_p1)
}
  0x9d   :  { %84 = dma.hbm_to_vmem [thread:$0]  %s2349_s4, 1024, %s79_s23, [#allocation9], %s1937_s1, %s1937_s1, %s1938_s30  }
  0x9e   :  { %s1948_s24 = smov [#allocation13]   ;;  %s1949_s7 = smov [#allocation16]  }
  0x9f   :  { %s102_s28 = sshll.u32 %s1948_s24, 4  ;;  %s126_s27 = sshll.u32 %s1949_s7, 4  ;;  %s103_s28 = int_to_ptr.vmem [resolvable:$true] %s102_s28  ;;  %s127_s27 = int_to_ptr.vmem [resolvable:$true] %s126_s27 }
  0xa0   :  { %s1785_s26 = scalar_lea.hbm %s2351_s6, 1024 }
  0xa1   :  { %p1786_p2 = scmp.ne.s32.totalorder %s2351_s6, %s1785_s26  ;;  %p1789_p3 = scmp.lt.u32.totalorder %s1785_s26, %s2351_s6 }
  0xa3   :  { %p1791_p4 = pnand %p1789_p3, %p1786_p2 }
  0xa5   :  { %1794 = shalt.err (!%p1791_p4)
}
  0xa6   :  { %s1795_s4 = scalar_lea.vmem %s103_s28, 1024  ;;  %p1800_p6 = scmp.lt.s32.totalorder %s103_s28, %s103_s28 }
  0xa7   :  { %p1796_p5 = scmp.ne.s32.totalorder %s103_s28, %s1795_s4  ;;  %p1801_p7 = scmp.lt.s32.totalorder %s1795_s4, %s1795_s4 }
  0xa9   :  { %p1802_p8 = por %p1801_p7, %p1800_p6 }
  0xab   :  { %p1803_p9 = pnand %p1802_p8, %p1796_p5 }
  0xad   :  { %1806 = shalt.err (!%p1803_p9)
}
  0xae   :  { %108 = dma.hbm_to_vmem [thread:$0]  %s2351_s6, 1024, %s103_s28, [#allocation12], %s1937_s1, %s1937_s1, %s1938_s30  }
  0xaf   :  { %s1807_s22 = scalar_lea.hbm %s2353_s8, 1024 }
  0xb0   :  { %p1808_p10 = scmp.ne.s32.totalorder %s2353_s8, %s1807_s22  ;;  %p1811_p11 = scmp.lt.u32.totalorder %s1807_s22, %s2353_s8 }
  0xb2   :  { %p1813_p12 = pnand %p1811_p11, %p1808_p10 }
  0xb4   :  { %1816 = shalt.err (!%p1813_p12)
}
  0xb5   :  { %s1817_s24 = scalar_lea.vmem %s127_s27, 1024  ;;  %p1822_p0 = scmp.lt.s32.totalorder %s127_s27, %s127_s27 }
  0xb6   :  { %p1818_p13 = scmp.ne.s32.totalorder %s127_s27, %s1817_s24  ;;  %p1823_p1 = scmp.lt.s32.totalorder %s1817_s24, %s1817_s24 }
  0xb8   :  { %p1824_p2 = por %p1823_p1, %p1822_p0 }
  0xba   :  { %p1825_p3 = pnand %p1824_p2, %p1818_p13 }
  0xbc   :  { %1828 = shalt.err (!%p1825_p3)
}
  0xbd   :  { %132 = dma.hbm_to_vmem [thread:$0]  %s2353_s8, 1024, %s127_s27, [#allocation15], %s1937_s1, %s1937_s1, %s1938_s30  }
  0xbe   :  { %s1950_s7 = smov [#allocation19]   ;;  %s1951_s0 = smov [#allocation22]  }
  0xbf   :  { %s148_s29 = sshll.u32 %s1950_s7, 4  ;;  %s170_s26 = sshll.u32 %s1951_s0, 4  ;;  %s149_s29 = int_to_ptr.vmem [resolvable:$true] %s148_s29  ;;  %s171_s26 = int_to_ptr.vmem [resolvable:$true] %s170_s26 }
  0xc0   :  { %s1829_s5 = scalar_lea.hbm %s2355_s10, 1024 }
  0xc1   :  { %p1830_p4 = scmp.ne.s32.totalorder %s2355_s10, %s1829_s5  ;;  %p1833_p5 = scmp.lt.u32.totalorder %s1829_s5, %s2355_s10 }
  0xc3   :  { %p1835_p6 = pnand %p1833_p5, %p1830_p4 }
  0xc5   :  { %1838 = shalt.err (!%p1835_p6)
}
  0xc6   :  { %s1839_s8 = scalar_lea.vmem %s149_s29, 1024  ;;  %p1844_p8 = scmp.lt.s32.totalorder %s149_s29, %s149_s29 }
  0xc7   :  { %p1840_p7 = scmp.ne.s32.totalorder %s149_s29, %s1839_s8  ;;  %p1845_p9 = scmp.lt.s32.totalorder %s1839_s8, %s1839_s8 }
  0xc9   :  { %p1846_p10 = por %p1845_p9, %p1844_p8 }
  0xcb   :  { %p1847_p11 = pnand %p1846_p10, %p1840_p7 }
  0xcd   :  { %1850 = shalt.err (!%p1847_p11)
}
  0xce   :  { %154 = dma.hbm_to_vmem [thread:$0]  %s2355_s10, 1024, %s149_s29, [#allocation18], %s1937_s1, %s1937_s1, %s1938_s30  }
  0xcf   :  { %s1851_s9 = scalar_lea.hbm %s2357_s12, 1024 }
  0xd0   :  { %p1852_p12 = scmp.ne.s32.totalorder %s2357_s12, %s1851_s9  ;;  %p1855_p13 = scmp.lt.u32.totalorder %s1851_s9, %s2357_s12 }
  0xd2   :  { %p1857_p0 = pnand %p1855_p13, %p1852_p12 }
  0xd4   :  { %1860 = shalt.err (!%p1857_p0)
}
  0xd5   :  { %s1861_s6 = scalar_lea.vmem %s171_s26, 1024  ;;  %p1866_p2 = scmp.lt.s32.totalorder %s171_s26, %s171_s26 }
  0xd6   :  { %p1862_p1 = scmp.ne.s32.totalorder %s171_s26, %s1861_s6  ;;  %p1867_p3 = scmp.lt.s32.totalorder %s1861_s6, %s1861_s6 }
  0xd8   :  { %p1868_p4 = por %p1867_p3, %p1866_p2 }
  0xda   :  { %p1869_p5 = pnand %p1868_p4, %p1862_p1 }
  0xdc   :  { %1872 = shalt.err (!%p1869_p5)
}
  0xdd   :  { %176 = dma.hbm_to_vmem [thread:$0]  %s2357_s12, 1024, %s171_s26, [#allocation21], %s1937_s1, %s1937_s1, %s1938_s30  }
  0xde   :  { %1917 = dma.done.wait [#allocation3], 256  }
  0xdf   :  { %1918 = vsyncadd [#allocation3], 4294967040 }
  0xe0   :  { %1919 = dma.done.wait [#allocation6], 32  }
  0xe1   :  { %1920 = vsyncadd [#allocation6], 4294967264 }
  0xe2   :  { %1921 = dma.done.wait [#allocation9], 1280  }
  0xe3   :  { %1922 = vsyncadd [#allocation9], 4294966016 }
  0xe4   :  { %1923 = dma.done.wait [#allocation12], 2048  }
  0xe5   :  { %1924 = vsyncadd [#allocation12], 4294965248 }
  0xe6   :  { %1925 = dma.done.wait [#allocation15], 2048  }
  0xe7   :  { %1926 = vsyncadd [#allocation15], 4294965248 }
  0xe8   :  { %1927 = dma.done.wait [#allocation18], 1040  }
  0xe9   :  { %1928 = vsyncadd [#allocation18], 4294966256 }
  0xea   :  { %1929 = dma.done.wait [#allocation21], 1040  }
  0xeb   :  { %1930 = vsyncadd [#allocation21], 4294966256  ;;  %vm219_vm0 = vcmask 261120   ;;  %v217_v0 = vld [vmem:[#allocation2] sm:$0xff]  ;;  %v218_v1 = vld [vmem:[#allocation2 + $0x8] sm:$0xff]  ;;  %v1952_v15 = vmov 0.0  }
  0xec   :  { %v220_v2 = vsel %vm219_vm0, %v217_v0, 0.0  ;;  %v223_v3 = vsel %vm219_vm0, %v218_v1, 0.0  ;;  %v1505_v14 = vld [vmem:[#allocation8] sm:$0xff]   ;;  %1336 = vmatprep.subr.bf16.mxu0 %v1952_v15  ;;  %1344 = vmatprep.subr.bf16.mxu1 %v1952_v15  ;;  %v1506_v16 = vld [vmem:[#allocation8 + $0x8] sm:$0xff]   ;;  %vm1953_vm1 = vmmov 0   ;;  %v1507_v17 = vld [vmem:[#allocation10] sm:$0xff]  }
  0xed   :  { %221 = vadd.xlane.f32.xlu0 %v220_v2  ;;  %1337 = vmatpush3.bf16.msra.mxu0 %v1505_v14  ;;  %v1508_v18 = vld [vmem:[#allocation10 + $0x8] sm:$0xff]   ;;  %v1509_v19 = vld [vmem:[#allocation10 + $0x10] sm:$0xff]   ;;  %v1510_v20 = vld [vmem:[#allocation10 + $0x18] sm:$0xff]   ;;  %s1954_s12 = smov [#allocation24]  }
  0xee   :  { %1340 = vmatprep.mubr.msk.bf16.mxu0 %vm1953_vm1, %v1952_v15  ;;  %1338 = vmatprep.subr.bf16.mxu0 %v1952_v15  ;;  %v1511_v21 = vld [vmem:[#allocation10 + $0x20] sm:$0xff]   ;;  %v1512_v22 = vld [vmem:[#allocation10 + $0x28] sm:$0xff]   ;;  %v1513_v23 = vld [vmem:[#allocation10 + $0x30] sm:$0xff]   ;;  %s1176_s7 = sshll.u32 %s1954_s12, 4  ;;  %s1177_s7 = int_to_ptr.vmem [resolvable:$true] %s1176_s7 }
  0xef   :  { %1360 = vmatprep.mubr.msk.bf16.mxu1 %vm1953_vm1, %v1952_v15  ;;  %1345 = vmatpush3.bf16.msra.mxu1 %v1507_v17  ;;  %v1198_v32 = vld [vmem:[#allocation5] ss:$0 sm:$0xff]  ;;  %v1199_v36 = vld [vmem:[#allocation7] ss:$0 sm:$0xff]  ;;  %v1514_v41 = vld [vmem:[#allocation10 + $0x38] sm:$0xff]   ;;  %s1873_s29 = scalar_lea.vmem %s1177_s7, 128  ;;  %p1878_p7 = scmp.lt.s32.totalorder %s1177_s7, %s1177_s7 }
  0xf0   :  { %1346 = vmatprep.subr.bf16.mxu1 %v1952_v15  ;;  %v1515_v42 = vld [vmem:[#allocation14] sm:$0xff]   ;;  %v1516_v43 = vld [vmem:[#allocation14 + $0x8] sm:$0xff]   ;;  %v1517_v44 = vld [vmem:[#allocation14 + $0x10] sm:$0xff]   ;;  %p1874_p6 = scmp.ne.s32.totalorder %s1177_s7, %s1873_s29  ;;  %p1879_p8 = scmp.lt.s32.totalorder %s1873_s29, %s1873_s29 }
  0xf1   :  { %224 = vadd.xlane.f32.xlu0 %v223_v3  ;;  %1339 = vmatpush3.bf16.msra.mxu0 %v1506_v16  ;;  %v1518_v52 = vld [vmem:[#allocation14 + $0x18] sm:$0xff]   ;;  %v1519_v53 = vld [vmem:[#allocation14 + $0x20] sm:$0xff]   ;;  %v1520_v54 = vld [vmem:[#allocation14 + $0x28] sm:$0xff]  }
  0xf2   :  { %1364 = vmatprep.subr.bf16.mxu0 %v1952_v15  ;;  %v1521_v55 = vld [vmem:[#allocation14 + $0x30] sm:$0xff]   ;;  %v1522_v56 = vld [vmem:[#allocation14 + $0x38] sm:$0xff]   ;;  %v1523_v57 = vld [vmem:[#allocation11] sm:$0xff]   ;;  %p1880_p9 = por %p1879_p8, %p1878_p7 }
  0xf3   :  { %1347 = vmatpush3.bf16.msra.mxu1 %v1508_v18  ;;  %v1524_v58 = vld [vmem:[#allocation11 + $0x8] sm:$0xff]   ;;  %v1525_v59 = vld [vmem:[#allocation11 + $0x10] sm:$0xff]   ;;  %v1526_v60 = vld [vmem:[#allocation11 + $0x18] sm:$0xff]  }
  0xf4   :  { %1348 = vmatprep.subr.bf16.mxu1 %v1952_v15  ;;  %v1527_v61 = vld [vmem:[#allocation11 + $0x20] sm:$0xff]   ;;  %v1528_v62 = vld [vmem:[#allocation11 + $0x28] sm:$0xff]   ;;  %v1529_v63 = vld [vmem:[#allocation11 + $0x30] sm:$0xff]   ;;  %p1881_p10 = pnand %p1880_p9, %p1874_p6 }
  0xf5   :  { %v1530_v14 = vld [vmem:[#allocation11 + $0x38] sm:$0xff]  }
  0xf7   :  { %1349 = vmatpush3.bf16.msra.mxu1 %v1509_v19 }
  0xf8   :  { %1350 = vmatprep.subr.bf16.mxu1 %v1952_v15 }
  0xfb   :  { %1351 = vmatpush3.bf16.msra.mxu1 %v1510_v20 }
  0xfc   :  { %1352 = vmatprep.subr.bf16.mxu1 %v1952_v15 }
  0xff   :  { %1353 = vmatpush3.bf16.msra.mxu1 %v1511_v21  ;;  %v666_v21 = vlaneseq }
 0x100   :  { %1354 = vmatprep.subr.bf16.mxu1 %v1952_v15 }
 0x103   :  { %1355 = vmatpush3.bf16.msra.mxu1 %v1512_v22  ;;  %v667_v22 = vand.u32 127, %v666_v21 }
 0x104   :  { %1356 = vmatprep.subr.bf16.mxu1 %v1952_v15 }
 0x105   :  { %vm668_vm2 = vcmp.lt.s32.totalorder %v667_v22, 12 }
 0x107   :  { %1357 = vmatpush3.bf16.msra.mxu1 %v1513_v23 }
 0x108   :  { %1358 = vmatprep.subr.bf16.mxu1 %v1952_v15 }
 0x10b   :  { %1359 = vmatpush3.bf16.msra.mxu1 %v1514_v41  ;;  %v1535_v41 = vld [vmem:[#allocation13 + $0x20] sm:$0xff]  }
 0x10c   :  { %1384 = vmatprep.subr.bf16.mxu1 %v1952_v15 }
 0x17a   :  { %v222_v4 = vpop.xlane.xlu0 %221 }
 0x17b   :  { %v227_v5 = vmul.f32 0.03125, %v222_v4 }
 0x17d   :  { %v229_v6 = vsub.f32 %v217_v0, %v227_v5 }
 0x17e   :  { %v225_v7 = vpop.xlane.xlu0 %224 }
 0x17f   :  { %v228_v8 = vmul.f32 0.03125, %v225_v7  ;;  %v231_v9 = vmul.f32 %v229_v6, %v229_v6 }
 0x181   :  { %v230_v10 = vsub.f32 %v218_v1, %v228_v8  ;;  %v233_v11 = vsel %vm219_vm0, %v231_v9, 0.0 }
 0x182   :  { %234 = vadd.xlane.f32.xlu1 %v233_v11 }
 0x183   :  { %v232_v12 = vmul.f32 %v230_v10, %v230_v10 }
 0x185   :  { %v236_v13 = vsel %vm219_vm0, %v232_v12, 0.0 }
 0x186   :  { %237 = vadd.xlane.f32.xlu1 %v236_v13 }
 0x20f   :  { %v235_v24 = vpop.xlane.xlu1 %234 }
 0x210   :  { %v239_v25 = vmul.f32 0.03125, %v235_v24 }
 0x212   :  { %v241_v26 = vadd.f32 1e-05, %v239_v25 }
 0x213   :  { %v238_v27 = vpop.xlane.xlu1 %237 }
 0x214   :  { %1563 = vrsqrt.f32 %v241_v26  ;;  %v240_v28 = vmul.f32 0.03125, %v238_v27 }
 0x216   :  { %v242_v29 = vadd.f32 1e-05, %v240_v28 }
 0x218   :  { %1565 = vrsqrt.f32 %v242_v29  ;;  %v1531_v29 = vld [vmem:[#allocation13] sm:$0xff]  }
 0x21e   :  { %v1564_v30 = vpop.eup %1563 }
 0x21f   :  { %v245_v31 = vmul.f32 %v1564_v30, %v229_v6  ;;  %v1532_v30 = vld [vmem:[#allocation13 + $0x8] sm:$0xff]  }
 0x221   :  { %v254_v35 = vmul.f32 %v1198_v32, %v245_v31  ;;  %v1533_v31 = vld [vmem:[#allocation13 + $0x10] sm:$0xff]  }
 0x222   :  { %v1566_v33 = vpop.eup %1565 }
 0x223   :  { %v246_v34 = vmul.f32 %v1566_v33, %v230_v10  ;;  %v263_v38 = vadd.f32 %v1199_v36, %v254_v35 }
 0x225   :  { %v255_v37 = vmul.f32 %v1198_v32, %v246_v34  ;;  %v1534_v32 = vld [vmem:[#allocation13 + $0x18] sm:$0xff]  }
 0x227   :  { %v264_v39 = vadd.f32 %v1199_v36, %v255_v37 }
 0x229   :  { %v265_v40 = vpack.c.bf16 %v264_v39, %v263_v38 }
 0x22b   :  { %1341 = vmatmul.mubr.msk.bf16.vlgmr.msra.gmra.mrb[0].mxu0 %vm219_vm0, %v265_v40 }
 0x22c   :  { %1380 = vmatprep.mubr.msk.bf16.mxu0 %vm1953_vm1, %v1952_v15  ;;  %1365 = vmatpush3.bf16.msra.mxu0 %v1515_v42  ;;  %v1536_v42 = vld [vmem:[#allocation13 + $0x28] sm:$0xff]  }
 0x22d   :  { %1366 = vmatprep.subr.bf16.mxu0 %v1952_v15 }
 0x230   :  { %1367 = vmatpush3.bf16.msra.mxu0 %v1516_v43  ;;  %v1537_v43 = vld [vmem:[#allocation13 + $0x30] sm:$0xff]  }
 0x231   :  { %1368 = vmatprep.subr.bf16.mxu0 %v1952_v15 }
 0x234   :  { %1369 = vmatpush3.bf16.msra.mxu0 %v1517_v44  ;;  %v1538_v44 = vld [vmem:[#allocation13 + $0x38] sm:$0xff]  }
 0x235   :  { %1370 = vmatprep.subr.bf16.mxu0 %v1952_v15 }
 0x238   :  { %1371 = vmatpush3.bf16.msra.mxu0 %v1518_v52 }
 0x239   :  { %1372 = vmatprep.subr.bf16.mxu0 %v1952_v15 }
 0x23c   :  { %1373 = vmatpush3.bf16.msra.mxu0 %v1519_v53 }
 0x23d   :  { %1374 = vmatprep.subr.bf16.mxu0 %v1952_v15 }
 0x240   :  { %1375 = vmatpush3.bf16.msra.mxu0 %v1520_v54 }
 0x241   :  { %1376 = vmatprep.subr.bf16.mxu0 %v1952_v15 }
 0x244   :  { %1377 = vmatpush3.bf16.msra.mxu0 %v1521_v55 }
 0x245   :  { %1378 = vmatprep.subr.bf16.mxu0 %v1952_v15 }
 0x248   :  { %1379 = vmatpush3.bf16.msra.mxu0 %v1522_v56 }
 0x249   :  { %1404 = vmatprep.subr.bf16.mxu0 %v1952_v15 }
 0x2fe   :  { %v319_v45 = vpop.f32.mrb[0].mxu0 }
 0x2ff   :  { %v1342_v46 = vpop.f32.mrb[1].mxu0  ;;  %v442_v47 = vmul.f32 %v319_v45, %v319_v45 }
 0x300   :  { %v322_v48 = vpop.f32.mrb[2].mxu0  ;;  %v1540_v46 = vld [vmem:[#allocation16 + $0x8] sm:$0xff]  }
 0x301   :  { %v326_v49 = vpack.c.bf16 %v322_v48, %v319_v45  ;;  %444 = vadd.xlane.f32.xlu0 %v442_v47  ;;  %v1343_v50 = vpop.f32.mrb[3].mxu0  ;;  %v443_v51 = vmul.f32 %v322_v48, %v322_v48  ;;  %v1541_v47 = vld [vmem:[#allocation16 + $0x10] sm:$0xff]  }
 0x302   :  { %v1544_v50 = vld [vmem:[#allocation16 + $0x28] sm:$0xff]  }
 0x303   :  { %446 = vadd.xlane.f32.xlu1 %v443_v51  ;;  %1361 = vmatmul.mubr.bf16.vlgmr.msra.gmra.mrb[0].mxu1 %v326_v49  ;;  %v1543_v49 = vld [vmem:[#allocation16 + $0x20] sm:$0xff]   ;;  %v1545_v51 = vld [vmem:[#allocation16 + $0x30] sm:$0xff]  }
 0x304   :  { %1400 = vmatprep.mubr.msk.bf16.mxu1 %vm1953_vm1, %v1952_v15  ;;  %1385 = vmatpush3.bf16.msra.mxu1 %v1523_v57 }
 0x305   :  { %1386 = vmatprep.subr.bf16.mxu1 %v1952_v15 }
 0x308   :  { %1387 = vmatpush3.bf16.msra.mxu1 %v1524_v58 }
 0x309   :  { %1388 = vmatprep.subr.bf16.mxu1 %v1952_v15 }
 0x30c   :  { %1389 = vmatpush3.bf16.msra.mxu1 %v1525_v59  ;;  %v1546_v59 = vld [vmem:[#allocation16 + $0x38] sm:$0xff]  }
 0x30d   :  { %1390 = vmatprep.subr.bf16.mxu1 %v1952_v15 }
 0x310   :  { %1391 = vmatpush3.bf16.msra.mxu1 %v1526_v60 }
 0x311   :  { %1392 = vmatprep.subr.bf16.mxu1 %v1952_v15 }
 0x314   :  { %1393 = vmatpush3.bf16.msra.mxu1 %v1527_v61 }
 0x315   :  { %1394 = vmatprep.subr.bf16.mxu1 %v1952_v15 }
 0x318   :  { %1395 = vmatpush3.bf16.msra.mxu1 %v1528_v62 }
 0x319   :  { %1396 = vmatprep.subr.bf16.mxu1 %v1952_v15 }
 0x31c   :  { %1397 = vmatpush3.bf16.msra.mxu1 %v1529_v63 }
 0x31d   :  { %1398 = vmatprep.subr.bf16.mxu1 %v1952_v15 }
 0x320   :  { %1399 = vmatpush3.bf16.msra.mxu1 %v1530_v14  ;;  %v1549_v14 = vld [vmem:[#allocation19 + $0x10] sm:$0xff]  }
 0x321   :  { %1424 = vmatprep.subr.bf16.mxu1 %v1952_v15 }
 0x38e   :  { %v445_v0 = vpop.xlane.xlu0 %444 }
 0x38f   :  { %v448_v1 = vmax.f32 %v445_v0, 1e-24 }
 0x390   :  { %v447_v2 = vpop.xlane.xlu1 %446 }
 0x391   :  { %1567 = vrsqrt.f32 %v448_v1  ;;  %v449_v3 = vmax.f32 %v447_v2, 1e-24  ;;  %v1547_v1 = vld [vmem:[#allocation19] sm:$0xff]   ;;  %v1548_v2 = vld [vmem:[#allocation19 + $0x8] sm:$0xff]  }
 0x393   :  { %1569 = vrsqrt.f32 %v449_v3  ;;  %v1237_v3 = vld [vmem:[#allocation17] ss:$0 sm:$0xff] }
 0x39b   :  { %v1568_v4 = vpop.eup %1567 }
 0x39c   :  { %v2268_v6 = vmul.f32 %v1568_v4, %v319_v45  ;;  %v1539_v45 = vld [vmem:[#allocation16] sm:$0xff]  }
 0x39d   :  { %v1570_v5 = vpop.eup %1569 }
 0x39e   :  { %v2270_v7 = vmul.f32 %v1570_v5, %v322_v48  ;;  %v1542_v48 = vld [vmem:[#allocation16 + $0x18] sm:$0xff]  }
 0x3a0   :  { %v454_v8 = vpack.c.bf16 %v2270_v7, %v2268_v6 }
 0x3a2   :  { %1381 = vmatmul.mubr.bf16.vlgmr.msra.gmra.mrb[4].mxu0 %v454_v8 }
 0x3a3   :  { %1420 = vmatprep.mubr.msk.bf16.mxu0 %vm1953_vm1, %v1952_v15  ;;  %1405 = vmatpush3.bf16.msra.mxu0 %v1531_v29 }
 0x3a4   :  { %1406 = vmatprep.subr.bf16.mxu0 %v1952_v15 }
 0x3a7   :  { %1407 = vmatpush3.bf16.msra.mxu0 %v1532_v30  ;;  %v920_v30 = vmul.f32 0.9, %v2268_v6  ;;  %v1246_v6 = vld [vmem:[#allocation20] ss:$0 sm:$0xff] }
 0x3a8   :  { %1408 = vmatprep.subr.bf16.mxu0 %v1952_v15 }
 0x3ab   :  { %1409 = vmatpush3.bf16.msra.mxu0 %v1533_v31  ;;  %v921_v31 = vmul.f32 0.9, %v2270_v7 }
 0x3ac   :  { %1410 = vmatprep.subr.bf16.mxu0 %v1952_v15 }
 0x3af   :  { %1411 = vmatpush3.bf16.msra.mxu0 %v1534_v32 }
 0x3b0   :  { %1412 = vmatprep.subr.bf16.mxu0 %v1952_v15 }
 0x3b3   :  { %1413 = vmatpush3.bf16.msra.mxu0 %v1535_v41 }
 0x3b4   :  { %1414 = vmatprep.subr.bf16.mxu0 %v1952_v15 }
 0x3b7   :  { %1415 = vmatpush3.bf16.msra.mxu0 %v1536_v42 }
 0x3b8   :  { %1416 = vmatprep.subr.bf16.mxu0 %v1952_v15 }
 0x3bb   :  { %1417 = vmatpush3.bf16.msra.mxu0 %v1537_v43 }
 0x3bc   :  { %1418 = vmatprep.subr.bf16.mxu0 %v1952_v15 }
 0x3bf   :  { %1419 = vmatpush3.bf16.msra.mxu0 %v1538_v44 }
 0x3c0   :  { %1444 = vmatprep.subr.bf16.mxu0 %v1952_v15 }
 0x3d6   :  { %v425_v9 = vpop.f32.mrb[0].mxu1 }
 0x3d7   :  { %v1362_v10 = vpop.f32.mrb[1].mxu1 }
 0x3d8   :  { %v428_v11 = vpop.f32.mrb[2].mxu1 }
 0x3d9   :  { %v1268_v12 = vpack.c.bf16 %v428_v11, %v425_v9  ;;  %v1363_v13 = vpop.f32.mrb[3].mxu1 }
 0x3db   :  { %1269 = vst [vmem:[#allocation24] sm:$0xff] %v1268_v12  }
 0x475   :  { %v553_v16 = vpop.f32.mrb[4].mxu0 }
 0x476   :  { %v1382_v17 = vpop.f32.mrb[5].mxu0 }
 0x477   :  { %v556_v18 = vpop.f32.mrb[6].mxu0  ;;  %v1551_v17 = vld [vmem:[#allocation19 + $0x20] sm:$0xff]  }
 0x478   :  { %v560_v19 = vpack.c.bf16 %v556_v18, %v553_v16  ;;  %v1383_v20 = vpop.f32.mrb[7].mxu0  ;;  %v1550_v16 = vld [vmem:[#allocation19 + $0x18] sm:$0xff]   ;;  %v1552_v18 = vld [vmem:[#allocation19 + $0x28] sm:$0xff]  }
 0x479   :  { %v1554_v20 = vld [vmem:[#allocation19 + $0x38] sm:$0xff]  }
 0x47a   :  { %1401 = vmatmul.mubr.bf16.vlgmr.msra.gmra.mrb[4].mxu1 %v560_v19  ;;  %v1553_v19 = vld [vmem:[#allocation19 + $0x30] sm:$0xff]  }
 0x47b   :  { %1440 = vmatprep.mubr.msk.bf16.mxu1 %vm1953_vm1, %v1952_v15  ;;  %1425 = vmatpush3.bf16.msra.mxu1 %v1539_v45 }
 0x47c   :  { %1426 = vmatprep.subr.bf16.mxu1 %v1952_v15 }
 0x47f   :  { %1427 = vmatpush3.bf16.msra.mxu1 %v1540_v46  ;;  %v1558_v46 = vld [vmem:[#allocation22 + $0x18] sm:$0xff]  }
 0x480   :  { %1428 = vmatprep.subr.bf16.mxu1 %v1952_v15 }
 0x483   :  { %1429 = vmatpush3.bf16.msra.mxu1 %v1541_v47  ;;  %v1559_v47 = vld [vmem:[#allocation22 + $0x20] sm:$0xff]  }
 0x484   :  { %1430 = vmatprep.subr.bf16.mxu1 %v1952_v15 }
 0x487   :  { %1431 = vmatpush3.bf16.msra.mxu1 %v1542_v48  ;;  %v1560_v48 = vld [vmem:[#allocation22 + $0x28] sm:$0xff]  }
 0x488   :  { %1432 = vmatprep.subr.bf16.mxu1 %v1952_v15 }
 0x48b   :  { %1433 = vmatpush3.bf16.msra.mxu1 %v1543_v49  ;;  %v1561_v49 = vld [vmem:[#allocation22 + $0x30] sm:$0xff]  }
 0x48c   :  { %1434 = vmatprep.subr.bf16.mxu1 %v1952_v15 }
 0x48f   :  { %1435 = vmatpush3.bf16.msra.mxu1 %v1544_v50  ;;  %v1562_v50 = vld [vmem:[#allocation22 + $0x38] sm:$0xff]  }
 0x490   :  { %1436 = vmatprep.subr.bf16.mxu1 %v1952_v15 }
 0x493   :  { %1437 = vmatpush3.bf16.msra.mxu1 %v1545_v51 }
 0x494   :  { %1438 = vmatprep.subr.bf16.mxu1 %v1952_v15 }
 0x497   :  { %1439 = vmatpush3.bf16.msra.mxu1 %v1546_v59 }
 0x498   :  { %1464 = vmatprep.subr.bf16.mxu1 %v1952_v15 }
 0x54d   :  { %v659_v23 = vpop.f32.mrb[4].mxu1 }
 0x54e   :  { %v1402_v24 = vpop.f32.mrb[5].mxu1  ;;  %v669_v25 = vsel %vm668_vm2, %v659_v23, -1e+30 }
 0x54f   :  { %671 = vmax.xlane.f32.xlu0 %v669_v25  ;;  %v662_v26 = vpop.f32.mrb[6].mxu1 }
 0x550   :  { %v1403_v27 = vpop.f32.mrb[7].mxu1  ;;  %v670_v28 = vsel %vm668_vm2, %v662_v26, -1e+30 }
 0x551   :  { %673 = vmax.xlane.f32.xlu1 %v670_v28 }
 0x5dc   :  { %v672_v33 = vpop.xlane.xlu0 %671 }
 0x5dd   :  { %v675_v34 = vsub.f32 %v669_v25, %v672_v33 }
 0x5de   :  { %v674_v35 = vpop.xlane.xlu1 %673 }
 0x5df   :  { %v677_v36 = vmul.f32 1.442695, %v675_v34  ;;  %v676_v37 = vsub.f32 %v670_v28, %v674_v35 }
 0x5e1   :  { %1571 = vpow2.f32 %v677_v36  ;;  %v679_v38 = vmul.f32 1.442695, %v676_v37  ;;  %v1555_v36 = vld [vmem:[#allocation22] sm:$0xff]   ;;  %v1556_v37 = vld [vmem:[#allocation22 + $0x8] sm:$0xff]  }
 0x5e3   :  { %1573 = vpow2.f32 %v679_v38  ;;  %v1557_v38 = vld [vmem:[#allocation22 + $0x10] sm:$0xff]  }
 0x5eb   :  { %v1572_v39 = vpop.eup %1571 }
 0x5ec   :  { %681 = vadd.xlane.f32.xlu0 %v1572_v39 }
 0x5ed   :  { %v1574_v40 = vpop.eup %1573 }
 0x5ee   :  { %683 = vadd.xlane.f32.xlu1 %v1574_v40 }
 0x679   :  { %v682_v52 = vpop.xlane.xlu0 %681 }
 0x67a   :  { %1575 = vrcp.f32 %v682_v52 }
 0x67b   :  { %v684_v53 = vpop.xlane.xlu1 %683 }
 0x67c   :  { %1577 = vrcp.f32 %v684_v53 }
 0x684   :  { %v1576_v54 = vpop.eup %1575 }
 0x685   :  { %v687_v56 = vmul.f32 %v1576_v54, %v1572_v39 }
 0x686   :  { %v1578_v55 = vpop.eup %1577 }
 0x687   :  { %v688_v57 = vmul.f32 %v1578_v55, %v1574_v40 }
 0x689   :  { %v689_v58 = vpack.c.bf16 %v688_v57, %v687_v56 }
 0x68b   :  { %1421 = vmatmul.mubr.bf16.vlgmr.msra.gmra.mrb[8].mxu0 %v689_v58 }
 0x68c   :  { %1460 = vmatprep.mubr.msk.bf16.mxu0 %vm1953_vm1, %v1952_v15  ;;  %1445 = vmatpush3.bf16.msra.mxu0 %v1547_v1 }
 0x68d   :  { %1446 = vmatprep.subr.bf16.mxu0 %v1952_v15 }
 0x690   :  { %1447 = vmatpush3.bf16.msra.mxu0 %v1548_v2 }
 0x691   :  { %1448 = vmatprep.subr.bf16.mxu0 %v1952_v15 }
 0x694   :  { %1449 = vmatpush3.bf16.msra.mxu0 %v1549_v14 }
 0x695   :  { %1450 = vmatprep.subr.bf16.mxu0 %v1952_v15 }
 0x698   :  { %1451 = vmatpush3.bf16.msra.mxu0 %v1550_v16 }
 0x699   :  { %1452 = vmatprep.subr.bf16.mxu0 %v1952_v15 }
 0x69c   :  { %1453 = vmatpush3.bf16.msra.mxu0 %v1551_v17 }
 0x69d   :  { %1454 = vmatprep.subr.bf16.mxu0 %v1952_v15 }
 0x6a0   :  { %1455 = vmatpush3.bf16.msra.mxu0 %v1552_v18 }
 0x6a1   :  { %1456 = vmatprep.subr.bf16.mxu0 %v1952_v15 }
 0x6a4   :  { %1457 = vmatpush3.bf16.msra.mxu0 %v1553_v19 }
 0x6a5   :  { %1458 = vmatprep.subr.bf16.mxu0 %v1952_v15 }
 0x6a8   :  { %1459 = vmatpush3.bf16.msra.mxu0 %v1554_v20 }
 0x75e   :  { %v788_v60 = vpop.f32.mrb[8].mxu0 }
 0x75f   :  { %v1422_v61 = vpop.f32.mrb[9].mxu0 }
 0x760   :  { %v791_v62 = vpop.f32.mrb[10].mxu0 }
 0x761   :  { %v795_v63 = vpack.c.bf16 %v791_v62, %v788_v60  ;;  %v1423_v0 = vpop.f32.mrb[11].mxu0 }
 0x763   :  { %1441 = vmatmul.mubr.bf16.vlgmr.msra.gmra.mrb[8].mxu1 %v795_v63 }
 0x764   :  { %1480 = vmatprep.mubr.msk.bf16.mxu1 %vm1953_vm1, %v1952_v15  ;;  %1465 = vmatpush3.bf16.msra.mxu1 %v1555_v36 }
 0x765   :  { %1466 = vmatprep.subr.bf16.mxu1 %v1952_v15 }
 0x768   :  { %1467 = vmatpush3.bf16.msra.mxu1 %v1556_v37 }
 0x769   :  { %1468 = vmatprep.subr.bf16.mxu1 %v1952_v15 }
 0x76c   :  { %1469 = vmatpush3.bf16.msra.mxu1 %v1557_v38 }
 0x76d   :  { %1470 = vmatprep.subr.bf16.mxu1 %v1952_v15 }
 0x770   :  { %1471 = vmatpush3.bf16.msra.mxu1 %v1558_v46 }
 0x771   :  { %1472 = vmatprep.subr.bf16.mxu1 %v1952_v15 }
 0x774   :  { %1473 = vmatpush3.bf16.msra.mxu1 %v1559_v47 }
 0x775   :  { %1474 = vmatprep.subr.bf16.mxu1 %v1952_v15 }
 0x778   :  { %1475 = vmatpush3.bf16.msra.mxu1 %v1560_v48 }
 0x779   :  { %1476 = vmatprep.subr.bf16.mxu1 %v1952_v15 }
 0x77c   :  { %1477 = vmatpush3.bf16.msra.mxu1 %v1561_v49 }
 0x77d   :  { %1478 = vmatprep.subr.bf16.mxu1 %v1952_v15 }
 0x780   :  { %1479 = vmatpush3.bf16.msra.mxu1 %v1562_v50 }
 0x836   :  { %v901_v4 = vpop.f32.mrb[8].mxu1 }
 0x837   :  { %v902_v5 = vadd.f32 %v1237_v3, %v901_v4  ;;  %v1442_v8 = vpop.f32.mrb[9].mxu1 }
 0x838   :  { %v904_v9 = vpop.f32.mrb[10].mxu1 }
 0x839   :  { %v905_v10 = vadd.f32 %v1237_v3, %v904_v9  ;;  %v1443_v11 = vpop.f32.mrb[11].mxu1  ;;  %v908_v12 = vmul.f32 %v902_v5, %v902_v5 }
 0x83b   :  { %910 = vadd.xlane.f32.xlu0 %v908_v12  ;;  %v909_v13 = vmul.f32 %v905_v10, %v905_v10 }
 0x83d   :  { %912 = vadd.xlane.f32.xlu1 %v909_v13 }
 0x8c8   :  { %v911_v21 = vpop.xlane.xlu0 %910 }
 0x8c9   :  { %v914_v22 = vmax.f32 %v911_v21, 1e-24 }
 0x8ca   :  { %v913_v23 = vpop.xlane.xlu1 %912 }
 0x8cb   :  { %1579 = vrsqrt.f32 %v914_v22  ;;  %v915_v24 = vmax.f32 %v913_v23, 1e-24 }
 0x8cd   :  { %1581 = vrsqrt.f32 %v915_v24 }
 0x8d5   :  { %v1580_v25 = vpop.eup %1579 }
 0x8d6   :  { %v918_v26 = vmul.f32 %v1580_v25, %v902_v5 }
 0x8d7   :  { %v1582_v27 = vpop.eup %1581 }
 0x8d8   :  { %v919_v28 = vmul.f32 %v1582_v27, %v905_v10  ;;  %v922_v29 = vmul.f32 0.1, %v918_v26 }
 0x8da   :  { %v923_v32 = vmul.f32 0.1, %v919_v28  ;;  %v924_v33 = vadd.f32 %v922_v29, %v920_v30 }
 0x8dc   :  { %v925_v34 = vadd.f32 %v923_v32, %v921_v31 }
 0x8de   :  { %v926_v35 = vpack.c.bf16 %v925_v34, %v924_v33 }
 0x8e0   :  { %1461 = vmatmul.mubr.bf16.vlgmr.msra.gmra.mrb[12].mxu0 %v926_v35 }
 0x9b3   :  { %v1032_v39 = vpop.f32.mrb[12].mxu0 }
 0x9b4   :  { %v1033_v7 = vadd.f32 %v1246_v6, %v1032_v39  ;;  %v1462_v40 = vpop.f32.mrb[13].mxu0 }
 0x9b5   :  { %v1035_v41 = vpop.f32.mrb[14].mxu0 }
 0x9b6   :  { %v1036_v42 = vadd.f32 %v1246_v6, %v1035_v41  ;;  %v1463_v43 = vpop.f32.mrb[15].mxu0  ;;  %v1039_v44 = vmul.f32 %v1033_v7, %v1033_v7 }
 0x9b8   :  { %1041 = vadd.xlane.f32.xlu0 %v1039_v44  ;;  %v1040_v45 = vmul.f32 %v1036_v42, %v1036_v42 }
 0x9ba   :  { %1043 = vadd.xlane.f32.xlu1 %v1040_v45 }
 0xa45   :  { %v1042_v51 = vpop.xlane.xlu0 %1041 }
 0xa46   :  { %v1045_v52 = vmax.f32 %v1042_v51, 1e-24 }
 0xa47   :  { %v1044_v53 = vpop.xlane.xlu1 %1043 }
 0xa48   :  { %1583 = vrsqrt.f32 %v1045_v52  ;;  %v1046_v54 = vmax.f32 %v1044_v53, 1e-24 }
 0xa4a   :  { %1585 = vrsqrt.f32 %v1046_v54 }
 0xa52   :  { %v1584_v55 = vpop.eup %1583 }
 0xa53   :  { %v1049_v57 = vmul.f32 %v1584_v55, %v1033_v7 }
 0xa54   :  { %v1586_v56 = vpop.eup %1585 }
 0xa55   :  { %v1050_v58 = vmul.f32 %v1586_v56, %v1036_v42 }
 0xa57   :  { %v1051_v59 = vpack.c.bf16 %v1050_v58, %v1049_v57 }
 0xa59   :  { %1481 = vmatmul.mubr.bf16.vlgmr.msra.gmra.mrb[12].mxu1 %v1051_v59 }
 0xa5a   :  { %1884 = shalt.err (!%p1881_p10)
}
 0xa5b   :  { %s1885_s15 = scalar_lea.hbm %s2359_s14, 128 }
 0xa5c   :  { %p1886_p11 = scmp.ne.s32.totalorder %s2359_s14, %s1885_s15  ;;  %p1889_p12 = scmp.lt.u32.totalorder %s1885_s15, %s2359_s14 }
 0xa5e   :  { %p1891_p13 = pnand %p1889_p12, %p1886_p11 }
 0xa60   :  { %1894 = shalt.err (!%p1891_p13)
}
 0xa61   :  { %1182 = dma.vmem_to_hbm [thread:$0]  %s1177_s7, 128, %s2359_s14, [#allocation25], %s1937_s1, %s1937_s1, %s1938_s30  }
 0xa62   :  { %s1955_s8 = smov [#allocation23]  }
 0xa63   :  { %s1164_s27 = sshll.u32 %s1955_s8, 4  ;;  %s1165_s27 = int_to_ptr.vmem [resolvable:$true] %s1164_s27 }
 0xa64   :  { %s1895_s20 = scalar_lea.vmem %s1165_s27, 256  ;;  %p1900_p1 = scmp.lt.s32.totalorder %s1165_s27, %s1165_s27 }
 0xa65   :  { %p1896_p0 = scmp.ne.s32.totalorder %s1165_s27, %s1895_s20  ;;  %p1901_p2 = scmp.lt.s32.totalorder %s1895_s20, %s1895_s20 }
 0xa67   :  { %p1902_p3 = por %p1901_p2, %p1900_p1 }
 0xa69   :  { %p1903_p4 = pnand %p1902_p3, %p1896_p0 }
 0xb2c   :  { %v1150_v15 = vpop.f32.mrb[12].mxu1 }
 0xb2d   :  { %1157 = vst [vmem:[#allocation23] sm:$0xff] %v1150_v15  ;;  %v1482_v60 = vpop.f32.mrb[13].mxu1 }
 0xb2e   :  { %v1153_v61 = vpop.f32.mrb[14].mxu1 }
 0xb2f   :  { %1158 = vst [vmem:[#allocation23 + $0x8] sm:$0xff] %v1153_v61  ;;  %v1483_v62 = vpop.f32.mrb[15].mxu1 }
 0xb30   :  { %1906 = shalt.err (!%p1903_p4)
}
 0xb31   :  { %s1907_s14 = scalar_lea.hbm %s2358_s13, 256 }
 0xb32   :  { %p1908_p5 = scmp.ne.s32.totalorder %s2358_s13, %s1907_s14  ;;  %p1911_p6 = scmp.lt.u32.totalorder %s1907_s14, %s2358_s13 }
 0xb34   :  { %p1913_p7 = pnand %p1911_p6, %p1908_p5 }
 0xb36   :  { %1916 = shalt.err (!%p1913_p7)
}
 0xb37   :  { %1170 = dma.vmem_to_hbm [thread:$0]  %s1165_s27, 256, %s2358_s13, [#allocation4], %s1944_s11, %s1944_s11, %s1945_s3  }
 0xb38   :  { %1931 = dma.done.wait [#allocation4], 256  }
 0xb39   :  { %1932 = vsyncadd [#allocation4], 4294967040 }
 0xb3a   :  { %1933 = dma.done.wait [#allocation25], 128  }
 0xb3b   :  { %1934 = vsyncadd [#allocation25], 4294967168 }
 0xb3c   :  { %1189 = vsyncpa [#allocation3], 1 }
 0xb3d   :  { %1190 = vsyncpa [#allocation6], 1 }
 0xb3e   :  { %1191 = vsyncpa [#allocation9], 1 }
 0xb3f   :  { %1192 = vsyncpa [#allocation12], 1 }
 0xb40   :  { %1193 = vsyncpa [#allocation15], 1 }
 0xb41   :  { %1194 = vsyncpa [#allocation18], 1 }
 0xb42   :  { %1195 = vsyncpa [#allocation21], 1 }
 0xb43   :  { %1196 = vsyncpa [#allocation4], 1 }
 0xb44   :  { %1197 = vsyncpa [#allocation25], 1 }

</bundles_post_ra>
